<compile_context>
chip_gen: v7x
topology: tpu7x:2x2x1
jax: 0.10.0
libtpu: 0.0.40
codegen_flags: <defaults>
</compile_context>

<pallas_src>
import numpy as np
import jax
import jax.numpy as jnp
from jax.experimental import pallas as pl
from jax.experimental.pallas import tpu as pltpu

# ---- small, deterministic config (stand-in for TransformerSConfig) ----------
D_MODEL = 32
N_HEADS = 4
D_HEAD = 8            # d_model == n_heads * d_head
D_FF = 64
N_ENC_LAYERS = 2
SRC_LEN = 8
SRC_SIZE = 4
TGT_SIZE = 4
BATCH = 2
LN_EPS = 1e-5

ROWS_X = BATCH * SRC_LEN          # 16 rows = 2 f32 vregs of sublanes
LANES = 128                       # slab / output lane width (one vreg)

# ---- packed parameter-slab row layout (every block start is 8-row aligned) --
ROW_POS    = 0                                  # (ROWS_X, D_MODEL) pos emb tiled over batch
ROW_MASK   = ROW_POS + ROWS_X                   # (ROWS_X, ROWS_X)  block-diag additive mask
ROW_WSRC   = ROW_MASK + ROWS_X                  # (SRC_SIZE, D_MODEL) input projection
ROW_VEC    = ROW_WSRC + 8                       # 1-row vectors: b_src, b_proj, per-layer b1,b2,g1,be1,g2,be2
N_VEC      = 2 + 6 * N_ENC_LAYERS
ROW_WPROJ  = ROW_VEC + 16                       # (D_MODEL, LANES) output proj, lane-padded
ROW_LAYER0 = ROW_WPROJ + D_MODEL
OFF_QKV, OFF_WO, OFF_W1, OFF_W2 = 0, D_MODEL, 2 * D_MODEL, 3 * D_MODEL
LAYER_STRIDE = 3 * D_MODEL + D_FF               # 160 rows per layer
ROW_TOTAL  = ROW_LAYER0 + N_ENC_LAYERS * LAYER_STRIDE   # 408 rows -> ~204 KB slab


# -----------------------------------------------------------------------------
# Fused kernel: embed -> N encoder layers -> projection, all in one body.
# -----------------------------------------------------------------------------
def transformer_kernel(src_ref, w_ref, o_ref):
    f32 = jnp.float32
    R = ROWS_X

    # ---- embedding: src @ W_src + b_src + pos_emb ----------------------------
    pos   = w_ref[ROW_POS:ROW_POS + R, 0:D_MODEL]                 # (16, 32)
    mask  = w_ref[ROW_MASK:ROW_MASK + R, 0:R]                     # (16, 16) 0 / -1e30
    w_src = w_ref[ROW_WSRC:ROW_WSRC + SRC_SIZE, 0:D_MODEL]        # (4, 32)
    b_src = w_ref[ROW_VEC:ROW_VEC + 1, 0:D_MODEL]                 # (1, 32)

    x = jnp.dot(src_ref[...], w_src, preferred_element_type=f32) + b_src + pos

    for l in range(N_ENC_LAYERS):                                 # static unroll
        base = ROW_LAYER0 + LAYER_STRIDE * l
        vb = ROW_VEC + 2 + 6 * l
        b1  = w_ref[vb + 0:vb + 1, 0:D_FF]
        b2  = w_ref[vb + 1:vb + 2, 0:D_MODEL]
        g1  = w_ref[vb + 2:vb + 3, 0:D_MODEL]
        be1 = w_ref[vb + 3:vb + 4, 0:D_MODEL]
        g2  = w_ref[vb + 4:vb + 5, 0:D_MODEL]
        be2 = w_ref[vb + 5:vb + 6, 0:D_MODEL]

        # ---- multi-head self-attention ---------------------------------------
        # Fused QKV projection: one (16,32)@(32,96) MXU push; 1/sqrt(d_head)
        # is already folded into the Wq columns at pack time.
        w_qkv = w_ref[base + OFF_QKV:base + OFF_QKV + D_MODEL, 0:3 * D_MODEL]
        qkv = jnp.dot(x, w_qkv, preferred_element_type=f32)       # (16, 96)

        ctx_heads = []
        for h in range(N_HEADS):                                  # static unroll
            c0 = h * D_HEAD
            q_h = qkv[:, c0:c0 + D_HEAD]                          # (16, 8)
            k_h = qkv[:, D_MODEL + c0:D_MODEL + c0 + D_HEAD]
            v_h = qkv[:, 2 * D_MODEL + c0:2 * D_MODEL + c0 + D_HEAD]
            # Full (16,16) scores + block-diagonal mask (no per-batch unroll,
            # no explicit K transpose: contract the last dims).
            s = jax.lax.dot_general(q_h, k_h, (((1,), (1,)), ((), ())),
                                    preferred_element_type=f32) + mask
            s = s - jnp.max(s, axis=-1, keepdims=True)
            e = jnp.exp(s)
            p = e / jnp.sum(e, axis=-1, keepdims=True)            # exact divide
            ctx_heads.append(jnp.dot(p, v_h, preferred_element_type=f32))
        # Lane-concat heads -> single (16,32)@(32,32) Wo matmul.
        ctx = jnp.concatenate(ctx_heads, axis=1)                  # (16, 32)
        w_o = w_ref[base + OFF_WO:base + OFF_WO + D_MODEL, 0:D_MODEL]
        attn_out = jnp.dot(ctx, w_o, preferred_element_type=f32)

        # ---- residual + LayerNorm 1 ------------------------------------------
        h1 = attn_out + x
        mu = jnp.mean(h1, axis=-1, keepdims=True)
        var = jnp.mean((h1 - mu) ** 2, axis=-1, keepdims=True)
        n1 = (h1 - mu) * jax.lax.rsqrt(var + LN_EPS) * g1 + be1

        # ---- feed-forward: Linear -> ReLU -> Linear (dropout = identity) -----
        w1 = w_ref[base + OFF_W1:base + OFF_W1 + D_MODEL, 0:D_FF]
        w2 = w_ref[base + OFF_W2:base + OFF_W2 + D_FF, 0:D_MODEL]
        f = jnp.maximum(jnp.dot(n1, w1, preferred_element_type=f32) + b1, 0.0)
        f = jnp.dot(f, w2, preferred_element_type=f32) + b2
        # TODO(synk): training-mode dropout not implemented (inference identity).

        # ---- residual + LayerNorm 2 ------------------------------------------
        h2 = f + n1
        mu2 = jnp.mean(h2, axis=-1, keepdims=True)
        var2 = jnp.mean((h2 - mu2) ** 2, axis=-1, keepdims=True)
        x = (h2 - mu2) * jax.lax.rsqrt(var2 + LN_EPS) * g2 + be2

    # ---- output projection: lane-dense (16, 128) store ------------------------
    # W_proj / b_proj are zero-padded to 128 lanes at pack time, so one MXU push
    # yields the full-lane output slab and the store is an unmasked vst.
    w_proj = w_ref[ROW_WPROJ:ROW_WPROJ + D_MODEL, :]              # (32, 128)
    b_proj = w_ref[ROW_VEC + 1:ROW_VEC + 2, :]                    # (1, 128)
    o_ref[...] = jnp.dot(x, w_proj, preferred_element_type=f32) + b_proj


# -----------------------------------------------------------------------------
# pallas_call wrapper (single fused launch, single grid step, 2 input DMAs)
# -----------------------------------------------------------------------------
def transformer_s_forward(src, tgt, slab):
    del tgt  # unused by the reference PyTorch forward
    B, S, _ = src.shape
    assert B == BATCH and S == SRC_LEN
    src_flat = src.reshape(B * S, SRC_SIZE)          # fold batch into sublanes

    out_padded = pl.pallas_call(
        transformer_kernel,
        out_shape=jax.ShapeDtypeStruct((B * S, LANES), jnp.float32),
        grid=(1,),
        in_specs=[pl.BlockSpec((B * S, SRC_SIZE), lambda i: (0, 0)),     # src data
                  pl.BlockSpec((ROW_TOTAL, LANES), lambda i: (0, 0))],   # param slab
        out_specs=pl.BlockSpec((B * S, LANES), lambda i: (0, 0)),
        compiler_params=pltpu.CompilerParams(
            dimension_semantics=("arbitrary",)),
    )(src_flat, slab)

    return out_padded[:, :TGT_SIZE].reshape(B, S, TGT_SIZE)


# -----------------------------------------------------------------------------
# Parameter init (deterministic), slab packing, and a pure-JAX reference.
# -----------------------------------------------------------------------------
def init_params(key):
    keys = iter(jax.random.split(key, 64))
    s = 0.05

    def rnd(shape):
        return (s * jax.random.normal(next(keys), shape)).astype(jnp.float32)

    params = {
        "pos_emb": rnd((SRC_LEN, D_MODEL)),
        "w_src": rnd((SRC_SIZE, D_MODEL)),     # stored [in, out]
        "b_src": rnd((1, D_MODEL)),
        "w_proj": rnd((D_MODEL, TGT_SIZE)),
        "b_proj": rnd((1, TGT_SIZE)),
        "layers": [],
    }
    for _ in range(N_ENC_LAYERS):
        params["layers"].append(dict(
            wq=rnd((D_MODEL, D_MODEL)), wk=rnd((D_MODEL, D_MODEL)),
            wv=rnd((D_MODEL, D_MODEL)), wo=rnd((D_MODEL, D_MODEL)),
            w1=rnd((D_MODEL, D_FF)),    b1=rnd((1, D_FF)),
            w2=rnd((D_FF, D_MODEL)),    b2=rnd((1, D_MODEL)),
            g1=jnp.ones((1, D_MODEL), jnp.float32),
            be1=jnp.zeros((1, D_MODEL), jnp.float32),
            g2=jnp.ones((1, D_MODEL), jnp.float32),
            be2=jnp.zeros((1, D_MODEL), jnp.float32),
        ))
    return params


def pack_params(params):
    """One-time host-side packing of all parameters into a single (408,128) slab."""
    slab = np.zeros((ROW_TOTAL, LANES), np.float32)
    scale = 1.0 / float(D_HEAD) ** 0.5

    slab[ROW_POS:ROW_POS + ROWS_X, :D_MODEL] = np.tile(
        np.asarray(params["pos_emb"]), (BATCH, 1))
    batch_id = np.arange(ROWS_X) // SRC_LEN
    slab[ROW_MASK:ROW_MASK + ROWS_X, :ROWS_X] = np.where(
        batch_id[:, None] == batch_id[None, :], 0.0, -1e30).astype(np.float32)
    slab[ROW_WSRC:ROW_WSRC + SRC_SIZE, :D_MODEL] = np.asarray(params["w_src"])
    slab[ROW_VEC, :D_MODEL] = np.asarray(params["b_src"]).reshape(-1)
    slab[ROW_VEC + 1, :TGT_SIZE] = np.asarray(params["b_proj"]).reshape(-1)
    slab[ROW_WPROJ:ROW_WPROJ + D_MODEL, :TGT_SIZE] = np.asarray(params["w_proj"])

    for l, lp in enumerate(params["layers"]):
        base = ROW_LAYER0 + LAYER_STRIDE * l
        # scale folded into Wq (exact one-time parameter transform)
        wqkv = np.concatenate([np.asarray(lp["wq"]) * scale,
                               np.asarray(lp["wk"]),
                               np.asarray(lp["wv"])], axis=1)          # (32, 96)
        slab[base + OFF_QKV:base + OFF_QKV + D_MODEL, :3 * D_MODEL] = wqkv
        slab[base + OFF_WO:base + OFF_WO + D_MODEL, :D_MODEL] = np.asarray(lp["wo"])
        slab[base + OFF_W1:base + OFF_W1 + D_MODEL, :D_FF] = np.asarray(lp["w1"])
        slab[base + OFF_W2:base + OFF_W2 + D_FF, :D_MODEL] = np.asarray(lp["w2"])
        vb = ROW_VEC + 2 + 6 * l
        slab[vb + 0, :D_FF]    = np.asarray(lp["b1"]).reshape(-1)
        slab[vb + 1, :D_MODEL] = np.asarray(lp["b2"]).reshape(-1)
        slab[vb + 2, :D_MODEL] = np.asarray(lp["g1"]).reshape(-1)
        slab[vb + 3, :D_MODEL] = np.asarray(lp["be1"]).reshape(-1)
        slab[vb + 4, :D_MODEL] = np.asarray(lp["g2"]).reshape(-1)
        slab[vb + 5, :D_MODEL] = np.asarray(lp["be2"]).reshape(-1)

    return jnp.asarray(slab)


def reference_forward(src, params):
    hp = jax.lax.Precision.HIGHEST

    def ln(x, g, b):
        mu = jnp.mean(x, axis=-1, keepdims=True)
        var = jnp.mean((x - mu) ** 2, axis=-1, keepdims=True)
        return (x - mu) * jax.lax.rsqrt(var + LN_EPS) * g + b

    x = jnp.einsum("bsi,io->bso", src, params["w_src"], precision=hp) \
        + params["b_src"] + params["pos_emb"][None]
    B = x.shape[0]
    for lp in params["layers"]:
        q = jnp.einsum("bsd,de->bse", x, lp["wq"], precision=hp)
        k = jnp.einsum("bsd,de->bse", x, lp["wk"], precision=hp)
        v = jnp.einsum("bsd,de->bse", x, lp["wv"], precision=hp)
        q = q.reshape(B, SRC_LEN, N_HEADS, D_HEAD).transpose(0, 2, 1, 3)
        k = k.reshape(B, SRC_LEN, N_HEADS, D_HEAD).transpose(0, 2, 1, 3)
        v = v.reshape(B, SRC_LEN, N_HEADS, D_HEAD).transpose(0, 2, 1, 3)
        scores = jnp.einsum("bhqd,bhkd->bhqk", q, k, precision=hp) \
            / jnp.sqrt(jnp.float32(D_HEAD))
        attn = jax.nn.softmax(scores, axis=-1)
        ctx = jnp.einsum("bhqk,bhkd->bhqd", attn, v, precision=hp).transpose(0, 2, 1, 3)
        ctx = ctx.reshape(B, SRC_LEN, D_MODEL)
        n1 = ln(jnp.einsum("bsd,de->bse", ctx, lp["wo"], precision=hp) + x,
                lp["g1"], lp["be1"])
        f = jnp.maximum(jnp.einsum("bsd,df->bsf", n1, lp["w1"], precision=hp)
                        + lp["b1"], 0.0)
        f = jnp.einsum("bsf,fd->bsd", f, lp["w2"], precision=hp) + lp["b2"]
        x = ln(f + n1, lp["g2"], lp["be2"])
    return jnp.einsum("bsd,dt->bst", x, params["w_proj"], precision=hp) + params["b_proj"]


# -----------------------------------------------------------------------------
if __name__ == "__main__":
    key = jax.random.PRNGKey(0)
    k_src, k_tgt, k_par = jax.random.split(key, 3)

    src = jax.random.normal(k_src, (BATCH, SRC_LEN, SRC_SIZE), dtype=jnp.float32)
    tgt = jax.random.normal(k_tgt, (BATCH, SRC_LEN, TGT_SIZE), dtype=jnp.float32)
    params = init_params(k_par)
    slab = pack_params(params)

    out = transformer_s_forward(src, tgt, slab)
    out = jax.block_until_ready(out)

    ref = reference_forward(src, params)
    assert out.shape == (BATCH, SRC_LEN, TGT_SIZE)
    # Tolerance tightened from 2e-3 (old approx-reciprocal softmax) to 5e-4 now
    # that the softmax uses an exact divide; remaining slack only covers MXU
    # f32 pass rounding vs. the highest-precision XLA reference.
    err = float(jnp.max(jnp.abs(out - ref)))
    assert err < 5e-4, f"mismatch vs pure-JAX reference: max abs err = {err}"

    print("KERNEL_OK")
</pallas_src>

<mosaic_0001>
module attributes {stable_mosaic.version = 11 : i64} {
  func.func @transformer_kernel(%arg0: i32, %arg1: memref<16x4xf32, #tpu.memory_space<vmem>>, %arg2: memref<408x128xf32, #tpu.memory_space<vmem>>, %arg3: memref<16x128xf32, #tpu.memory_space<vmem>>) attributes {dimension_semantics = [#tpu.dimension_semantics<arbitrary>], iteration_bounds = array<i64: 1>, scalar_prefetch = 0 : i64, scratch_operands = 0 : i64, tpu.core_type = #tpu.core_type<tc>, window_params = [{pipeline_mode = #tpu.pipeline_mode<synchronous>, transform_indices = @transform_0, window_bounds = array<i64: 16, 4>}, {pipeline_mode = #tpu.pipeline_mode<synchronous>, transform_indices = @transform_1, window_bounds = array<i64: 408, 128>}, {pipeline_mode = #tpu.pipeline_mode<synchronous>, transform_indices = @transform_2, window_bounds = array<i64: 16, 128>}]} {
    %c0 = arith.constant 0 : index
    %c0_0 = arith.constant 0 : index
    %0 = vector.load %arg2[%c0, %c0_0] : memref<408x128xf32, #tpu.memory_space<vmem>>, vector<16x32xf32>
    %c16 = arith.constant 16 : index
    %c0_1 = arith.constant 0 : index
    %1 = vector.load %arg2[%c16, %c0_1] : memref<408x128xf32, #tpu.memory_space<vmem>>, vector<16x16xf32>
    %c32 = arith.constant 32 : index
    %c0_2 = arith.constant 0 : index
    %2 = vector.load %arg2[%c32, %c0_2] : memref<408x128xf32, #tpu.memory_space<vmem>>, vector<4x32xf32>
    %c40 = arith.constant 40 : index
    %c0_3 = arith.constant 0 : index
    %3 = vector.load %arg2[%c40, %c0_3] : memref<408x128xf32, #tpu.memory_space<vmem>>, vector<1x32xf32>
    %c0_4 = arith.constant 0 : index
    %c0_5 = arith.constant 0 : index
    %4 = vector.load %arg1[%c0_4, %c0_5] : memref<16x4xf32, #tpu.memory_space<vmem>>, vector<16x4xf32>
    %cst = arith.constant dense<0.000000e+00> : vector<16x32xf32>
    %5 = tpu.matmul %4, %2, %cst {dimension_numbers = #tpu.dot_dimension_numbers<[1], [0], [0], [1], [0, 0, 1, 1], [], []>} : vector<16x4xf32>, vector<4x32xf32>, vector<16x32xf32> -> vector<16x32xf32>
    %6 = vector.broadcast %3 : vector<1x32xf32> to vector<16x32xf32>
    %7 = arith.addf %5, %6 : vector<16x32xf32>
    %8 = arith.addf %7, %0 : vector<16x32xf32>
    %c42 = arith.constant 42 : index
    %c0_6 = arith.constant 0 : index
    %9 = vector.load %arg2[%c42, %c0_6] : memref<408x128xf32, #tpu.memory_space<vmem>>, vector<1x64xf32>
    %c43 = arith.constant 43 : index
    %c0_7 = arith.constant 0 : index
    %10 = vector.load %arg2[%c43, %c0_7] : memref<408x128xf32, #tpu.memory_space<vmem>>, vector<1x32xf32>
    %c44 = arith.constant 44 : index
    %c0_8 = arith.constant 0 : index
    %11 = vector.load %arg2[%c44, %c0_8] : memref<408x128xf32, #tpu.memory_space<vmem>>, vector<1x32xf32>
    %c45 = arith.constant 45 : index
    %c0_9 = arith.constant 0 : index
    %12 = vector.load %arg2[%c45, %c0_9] : memref<408x128xf32, #tpu.memory_space<vmem>>, vector<1x32xf32>
    %c46 = arith.constant 46 : index
    %c0_10 = arith.constant 0 : index
    %13 = vector.load %arg2[%c46, %c0_10] : memref<408x128xf32, #tpu.memory_space<vmem>>, vector<1x32xf32>
    %c47 = arith.constant 47 : index
    %c0_11 = arith.constant 0 : index
    %14 = vector.load %arg2[%c47, %c0_11] : memref<408x128xf32, #tpu.memory_space<vmem>>, vector<1x32xf32>
    %c88 = arith.constant 88 : index
    %c0_12 = arith.constant 0 : index
    %15 = vector.load %arg2[%c88, %c0_12] : memref<408x128xf32, #tpu.memory_space<vmem>>, vector<32x96xf32>
    %cst_13 = arith.constant dense<0.000000e+00> : vector<16x96xf32>
    %16 = tpu.matmul %8, %15, %cst_13 {dimension_numbers = #tpu.dot_dimension_numbers<[1], [0], [0], [1], [0, 0, 1, 1], [], []>} : vector<16x32xf32>, vector<32x96xf32>, vector<16x96xf32> -> vector<16x96xf32>
    %17 = vector.extract_strided_slice %16 {offsets = [0, 0], sizes = [16, 8], strides = [1, 1]} : vector<16x96xf32> to vector<16x8xf32>
    %18 = vector.extract_strided_slice %16 {offsets = [0, 32], sizes = [16, 8], strides = [1, 1]} : vector<16x96xf32> to vector<16x8xf32>
    %19 = vector.extract_strided_slice %16 {offsets = [0, 64], sizes = [16, 8], strides = [1, 1]} : vector<16x96xf32> to vector<16x8xf32>
    %cst_14 = arith.constant dense<0.000000e+00> : vector<16x16xf32>
    %20 = tpu.matmul %17, %18, %cst_14 {dimension_numbers = #tpu.dot_dimension_numbers<[1], [1], [0], [0], [0, 0, 1, 0], [], []>} : vector<16x8xf32>, vector<16x8xf32>, vector<16x16xf32> -> vector<16x16xf32>
    %21 = arith.addf %20, %1 : vector<16x16xf32>
    %cst_15 = arith.constant dense<0xFF800000> : vector<16xf32>
    %22 = vector.multi_reduction <maximumf>, %21, %cst_15 [1] : vector<16x16xf32> to vector<16xf32>
    %23 = vector.shape_cast %22 : vector<16xf32> to vector<16x1xf32>
    %24 = vector.broadcast %23 : vector<16x1xf32> to vector<16x16xf32>
    %25 = arith.subf %21, %24 : vector<16x16xf32>
    %26 = math.exp %25 : vector<16x16xf32>
    %cst_16 = arith.constant dense<0.000000e+00> : vector<16xf32>
    %27 = vector.multi_reduction <add>, %26, %cst_16 [1] : vector<16x16xf32> to vector<16xf32>
    %28 = vector.shape_cast %27 : vector<16xf32> to vector<16x1xf32>
    %29 = vector.broadcast %28 : vector<16x1xf32> to vector<16x16xf32>
    %30 = arith.divf %26, %29 : vector<16x16xf32>
    %cst_17 = arith.constant dense<0.000000e+00> : vector<16x8xf32>
    %31 = tpu.matmul %30, %19, %cst_17 {dimension_numbers = #tpu.dot_dimension_numbers<[1], [0], [0], [1], [0, 0, 1, 1], [], []>} : vector<16x16xf32>, vector<16x8xf32>, vector<16x8xf32> -> vector<16x8xf32>
    %32 = vector.extract_strided_slice %16 {offsets = [0, 8], sizes = [16, 8], strides = [1, 1]} : vector<16x96xf32> to vector<16x8xf32>
    %33 = vector.extract_strided_slice %16 {offsets = [0, 40], sizes = [16, 8], strides = [1, 1]} : vector<16x96xf32> to vector<16x8xf32>
    %34 = vector.extract_strided_slice %16 {offsets = [0, 72], sizes = [16, 8], strides = [1, 1]} : vector<16x96xf32> to vector<16x8xf32>
    %cst_18 = arith.constant dense<0.000000e+00> : vector<16x16xf32>
    %35 = tpu.matmul %32, %33, %cst_18 {dimension_numbers = #tpu.dot_dimension_numbers<[1], [1], [0], [0], [0, 0, 1, 0], [], []>} : vector<16x8xf32>, vector<16x8xf32>, vector<16x16xf32> -> vector<16x16xf32>
    %36 = arith.addf %35, %1 : vector<16x16xf32>
    %cst_19 = arith.constant dense<0xFF800000> : vector<16xf32>
    %37 = vector.multi_reduction <maximumf>, %36, %cst_19 [1] : vector<16x16xf32> to vector<16xf32>
    %38 = vector.shape_cast %37 : vector<16xf32> to vector<16x1xf32>
    %39 = vector.broadcast %38 : vector<16x1xf32> to vector<16x16xf32>
    %40 = arith.subf %36, %39 : vector<16x16xf32>
    %41 = math.exp %40 : vector<16x16xf32>
    %cst_20 = arith.constant dense<0.000000e+00> : vector<16xf32>
    %42 = vector.multi_reduction <add>, %41, %cst_20 [1] : vector<16x16xf32> to vector<16xf32>
    %43 = vector.shape_cast %42 : vector<16xf32> to vector<16x1xf32>
    %44 = vector.broadcast %43 : vector<16x1xf32> to vector<16x16xf32>
    %45 = arith.divf %41, %44 : vector<16x16xf32>
    %cst_21 = arith.constant dense<0.000000e+00> : vector<16x8xf32>
    %46 = tpu.matmul %45, %34, %cst_21 {dimension_numbers = #tpu.dot_dimension_numbers<[1], [0], [0], [1], [0, 0, 1, 1], [], []>} : vector<16x16xf32>, vector<16x8xf32>, vector<16x8xf32> -> vector<16x8xf32>
    %47 = vector.extract_strided_slice %16 {offsets = [0, 16], sizes = [16, 8], strides = [1, 1]} : vector<16x96xf32> to vector<16x8xf32>
    %48 = vector.extract_strided_slice %16 {offsets = [0, 48], sizes = [16, 8], strides = [1, 1]} : vector<16x96xf32> to vector<16x8xf32>
    %49 = vector.extract_strided_slice %16 {offsets = [0, 80], sizes = [16, 8], strides = [1, 1]} : vector<16x96xf32> to vector<16x8xf32>
    %cst_22 = arith.constant dense<0.000000e+00> : vector<16x16xf32>
    %50 = tpu.matmul %47, %48, %cst_22 {dimension_numbers = #tpu.dot_dimension_numbers<[1], [1], [0], [0], [0, 0, 1, 0], [], []>} : vector<16x8xf32>, vector<16x8xf32>, vector<16x16xf32> -> vector<16x16xf32>
    %51 = arith.addf %50, %1 : vector<16x16xf32>
    %cst_23 = arith.constant dense<0xFF800000> : vector<16xf32>
    %52 = vector.multi_reduction <maximumf>, %51, %cst_23 [1] : vector<16x16xf32> to vector<16xf32>
    %53 = vector.shape_cast %52 : vector<16xf32> to vector<16x1xf32>
    %54 = vector.broadcast %53 : vector<16x1xf32> to vector<16x16xf32>
    %55 = arith.subf %51, %54 : vector<16x16xf32>
    %56 = math.exp %55 : vector<16x16xf32>
    %cst_24 = arith.constant dense<0.000000e+00> : vector<16xf32>
    %57 = vector.multi_reduction <add>, %56, %cst_24 [1] : vector<16x16xf32> to vector<16xf32>
    %58 = vector.shape_cast %57 : vector<16xf32> to vector<16x1xf32>
    %59 = vector.broadcast %58 : vector<16x1xf32> to vector<16x16xf32>
    %60 = arith.divf %56, %59 : vector<16x16xf32>
    %cst_25 = arith.constant dense<0.000000e+00> : vector<16x8xf32>
    %61 = tpu.matmul %60, %49, %cst_25 {dimension_numbers = #tpu.dot_dimension_numbers<[1], [0], [0], [1], [0, 0, 1, 1], [], []>} : vector<16x16xf32>, vector<16x8xf32>, vector<16x8xf32> -> vector<16x8xf32>
    %62 = vector.extract_strided_slice %16 {offsets = [0, 24], sizes = [16, 8], strides = [1, 1]} : vector<16x96xf32> to vector<16x8xf32>
    %63 = vector.extract_strided_slice %16 {offsets = [0, 56], sizes = [16, 8], strides = [1, 1]} : vector<16x96xf32> to vector<16x8xf32>
    %64 = vector.extract_strided_slice %16 {offsets = [0, 88], sizes = [16, 8], strides = [1, 1]} : vector<16x96xf32> to vector<16x8xf32>
    %cst_26 = arith.constant dense<0.000000e+00> : vector<16x16xf32>
    %65 = tpu.matmul %62, %63, %cst_26 {dimension_numbers = #tpu.dot_dimension_numbers<[1], [1], [0], [0], [0, 0, 1, 0], [], []>} : vector<16x8xf32>, vector<16x8xf32>, vector<16x16xf32> -> vector<16x16xf32>
    %66 = arith.addf %65, %1 : vector<16x16xf32>
    %cst_27 = arith.constant dense<0xFF800000> : vector<16xf32>
    %67 = vector.multi_reduction <maximumf>, %66, %cst_27 [1] : vector<16x16xf32> to vector<16xf32>
    %68 = vector.shape_cast %67 : vector<16xf32> to vector<16x1xf32>
    %69 = vector.broadcast %68 : vector<16x1xf32> to vector<16x16xf32>
    %70 = arith.subf %66, %69 : vector<16x16xf32>
    %71 = math.exp %70 : vector<16x16xf32>
    %cst_28 = arith.constant dense<0.000000e+00> : vector<16xf32>
    %72 = vector.multi_reduction <add>, %71, %cst_28 [1] : vector<16x16xf32> to vector<16xf32>
    %73 = vector.shape_cast %72 : vector<16xf32> to vector<16x1xf32>
    %74 = vector.broadcast %73 : vector<16x1xf32> to vector<16x16xf32>
    %75 = arith.divf %71, %74 : vector<16x16xf32>
    %cst_29 = arith.constant dense<0.000000e+00> : vector<16x8xf32>
    %76 = tpu.matmul %75, %64, %cst_29 {dimension_numbers = #tpu.dot_dimension_numbers<[1], [0], [0], [1], [0, 0, 1, 1], [], []>} : vector<16x16xf32>, vector<16x8xf32>, vector<16x8xf32> -> vector<16x8xf32>
    %77 = tpu.concatenate %31, %46, %61, %76 in 1 : vector<16x8xf32>, vector<16x8xf32>, vector<16x8xf32>, vector<16x8xf32> -> vector<16x32xf32>
    %c120 = arith.constant 120 : index
    %c0_30 = arith.constant 0 : index
    %78 = vector.load %arg2[%c120, %c0_30] : memref<408x128xf32, #tpu.memory_space<vmem>>, vector<32x32xf32>
    %cst_31 = arith.constant dense<0.000000e+00> : vector<16x32xf32>
    %79 = tpu.matmul %77, %78, %cst_31 {dimension_numbers = #tpu.dot_dimension_numbers<[1], [0], [0], [1], [0, 0, 1, 1], [], []>} : vector<16x32xf32>, vector<32x32xf32>, vector<16x32xf32> -> vector<16x32xf32>
    %80 = arith.addf %79, %8 : vector<16x32xf32>
    %cst_32 = arith.constant dense<0.000000e+00> : vector<16xf32>
    %81 = vector.multi_reduction <add>, %80, %cst_32 [1] : vector<16x32xf32> to vector<16xf32>
    %82 = vector.shape_cast %81 : vector<16xf32> to vector<16x1xf32>
    %cst_33 = arith.constant 3.200000e+01 : f32
    %83 = vector.broadcast %cst_33 : f32 to vector<16x1xf32>
    %84 = arith.divf %82, %83 : vector<16x1xf32>
    %85 = vector.broadcast %84 : vector<16x1xf32> to vector<16x32xf32>
    %86 = arith.subf %80, %85 : vector<16x32xf32>
    %87 = arith.mulf %86, %86 : vector<16x32xf32>
    %cst_34 = arith.constant dense<0.000000e+00> : vector<16xf32>
    %88 = vector.multi_reduction <add>, %87, %cst_34 [1] : vector<16x32xf32> to vector<16xf32>
    %89 = vector.shape_cast %88 : vector<16xf32> to vector<16x1xf32>
    %cst_35 = arith.constant 3.200000e+01 : f32
    %90 = vector.broadcast %cst_35 : f32 to vector<16x1xf32>
    %91 = arith.divf %89, %90 : vector<16x1xf32>
    %92 = vector.broadcast %84 : vector<16x1xf32> to vector<16x32xf32>
    %93 = arith.subf %80, %92 : vector<16x32xf32>
    %cst_36 = arith.constant 9.99999974E-6 : f32
    %94 = vector.broadcast %cst_36 : f32 to vector<16x1xf32>
    %95 = arith.addf %91, %94 : vector<16x1xf32>
    %96 = math.rsqrt %95 : vector<16x1xf32>
    %97 = vector.broadcast %96 : vector<16x1xf32> to vector<16x32xf32>
    %98 = arith.mulf %93, %97 : vector<16x32xf32>
    %99 = vector.broadcast %11 : vector<1x32xf32> to vector<16x32xf32>
    %100 = arith.mulf %98, %99 : vector<16x32xf32>
    %101 = vector.broadcast %12 : vector<1x32xf32> to vector<16x32xf32>
    %102 = arith.addf %100, %101 : vector<16x32xf32>
    %c152 = arith.constant 152 : index
    %c0_37 = arith.constant 0 : index
    %103 = vector.load %arg2[%c152, %c0_37] : memref<408x128xf32, #tpu.memory_space<vmem>>, vector<32x64xf32>
    %c184 = arith.constant 184 : index
    %c0_38 = arith.constant 0 : index
    %104 = vector.load %arg2[%c184, %c0_38] : memref<408x128xf32, #tpu.memory_space<vmem>>, vector<64x32xf32>
    %cst_39 = arith.constant dense<0.000000e+00> : vector<16x64xf32>
    %105 = tpu.matmul %102, %103, %cst_39 {dimension_numbers = #tpu.dot_dimension_numbers<[1], [0], [0], [1], [0, 0, 1, 1], [], []>} : vector<16x32xf32>, vector<32x64xf32>, vector<16x64xf32> -> vector<16x64xf32>
    %106 = vector.broadcast %9 : vector<1x64xf32> to vector<16x64xf32>
    %107 = arith.addf %105, %106 : vector<16x64xf32>
    %cst_40 = arith.constant 0.000000e+00 : f32
    %108 = vector.broadcast %cst_40 : f32 to vector<16x64xf32>
    %109 = arith.maximumf %107, %108 : vector<16x64xf32>
    %cst_41 = arith.constant dense<0.000000e+00> : vector<16x32xf32>
    %110 = tpu.matmul %109, %104, %cst_41 {dimension_numbers = #tpu.dot_dimension_numbers<[1], [0], [0], [1], [0, 0, 1, 1], [], []>} : vector<16x64xf32>, vector<64x32xf32>, vector<16x32xf32> -> vector<16x32xf32>
    %111 = vector.broadcast %10 : vector<1x32xf32> to vector<16x32xf32>
    %112 = arith.addf %110, %111 : vector<16x32xf32>
    %113 = arith.addf %112, %102 : vector<16x32xf32>
    %cst_42 = arith.constant dense<0.000000e+00> : vector<16xf32>
    %114 = vector.multi_reduction <add>, %113, %cst_42 [1] : vector<16x32xf32> to vector<16xf32>
    %115 = vector.shape_cast %114 : vector<16xf32> to vector<16x1xf32>
    %cst_43 = arith.constant 3.200000e+01 : f32
    %116 = vector.broadcast %cst_43 : f32 to vector<16x1xf32>
    %117 = arith.divf %115, %116 : vector<16x1xf32>
    %118 = vector.broadcast %117 : vector<16x1xf32> to vector<16x32xf32>
    %119 = arith.subf %113, %118 : vector<16x32xf32>
    %120 = arith.mulf %119, %119 : vector<16x32xf32>
    %cst_44 = arith.constant dense<0.000000e+00> : vector<16xf32>
    %121 = vector.multi_reduction <add>, %120, %cst_44 [1] : vector<16x32xf32> to vector<16xf32>
    %122 = vector.shape_cast %121 : vector<16xf32> to vector<16x1xf32>
    %cst_45 = arith.constant 3.200000e+01 : f32
    %123 = vector.broadcast %cst_45 : f32 to vector<16x1xf32>
    %124 = arith.divf %122, %123 : vector<16x1xf32>
    %125 = vector.broadcast %117 : vector<16x1xf32> to vector<16x32xf32>
    %126 = arith.subf %113, %125 : vector<16x32xf32>
    %cst_46 = arith.constant 9.99999974E-6 : f32
    %127 = vector.broadcast %cst_46 : f32 to vector<16x1xf32>
    %128 = arith.addf %124, %127 : vector<16x1xf32>
    %129 = math.rsqrt %128 : vector<16x1xf32>
    %130 = vector.broadcast %129 : vector<16x1xf32> to vector<16x32xf32>
    %131 = arith.mulf %126, %130 : vector<16x32xf32>
    %132 = vector.broadcast %13 : vector<1x32xf32> to vector<16x32xf32>
    %133 = arith.mulf %131, %132 : vector<16x32xf32>
    %134 = vector.broadcast %14 : vector<1x32xf32> to vector<16x32xf32>
    %135 = arith.addf %133, %134 : vector<16x32xf32>
    %c48 = arith.constant 48 : index
    %c0_47 = arith.constant 0 : index
    %136 = vector.load %arg2[%c48, %c0_47] : memref<408x128xf32, #tpu.memory_space<vmem>>, vector<1x64xf32>
    %c49 = arith.constant 49 : index
    %c0_48 = arith.constant 0 : index
    %137 = vector.load %arg2[%c49, %c0_48] : memref<408x128xf32, #tpu.memory_space<vmem>>, vector<1x32xf32>
    %c50 = arith.constant 50 : index
    %c0_49 = arith.constant 0 : index
    %138 = vector.load %arg2[%c50, %c0_49] : memref<408x128xf32, #tpu.memory_space<vmem>>, vector<1x32xf32>
    %c51 = arith.constant 51 : index
    %c0_50 = arith.constant 0 : index
    %139 = vector.load %arg2[%c51, %c0_50] : memref<408x128xf32, #tpu.memory_space<vmem>>, vector<1x32xf32>
    %c52 = arith.constant 52 : index
    %c0_51 = arith.constant 0 : index
    %140 = vector.load %arg2[%c52, %c0_51] : memref<408x128xf32, #tpu.memory_space<vmem>>, vector<1x32xf32>
    %c53 = arith.constant 53 : index
    %c0_52 = arith.constant 0 : index
    %141 = vector.load %arg2[%c53, %c0_52] : memref<408x128xf32, #tpu.memory_space<vmem>>, vector<1x32xf32>
    %c248 = arith.constant 248 : index
    %c0_53 = arith.constant 0 : index
    %142 = vector.load %arg2[%c248, %c0_53] : memref<408x128xf32, #tpu.memory_space<vmem>>, vector<32x96xf32>
    %cst_54 = arith.constant dense<0.000000e+00> : vector<16x96xf32>
    %143 = tpu.matmul %135, %142, %cst_54 {dimension_numbers = #tpu.dot_dimension_numbers<[1], [0], [0], [1], [0, 0, 1, 1], [], []>} : vector<16x32xf32>, vector<32x96xf32>, vector<16x96xf32> -> vector<16x96xf32>
    %144 = vector.extract_strided_slice %143 {offsets = [0, 0], sizes = [16, 8], strides = [1, 1]} : vector<16x96xf32> to vector<16x8xf32>
    %145 = vector.extract_strided_slice %143 {offsets = [0, 32], sizes = [16, 8], strides = [1, 1]} : vector<16x96xf32> to vector<16x8xf32>
    %146 = vector.extract_strided_slice %143 {offsets = [0, 64], sizes = [16, 8], strides = [1, 1]} : vector<16x96xf32> to vector<16x8xf32>
    %cst_55 = arith.constant dense<0.000000e+00> : vector<16x16xf32>
    %147 = tpu.matmul %144, %145, %cst_55 {dimension_numbers = #tpu.dot_dimension_numbers<[1], [1], [0], [0], [0, 0, 1, 0], [], []>} : vector<16x8xf32>, vector<16x8xf32>, vector<16x16xf32> -> vector<16x16xf32>
    %148 = arith.addf %147, %1 : vector<16x16xf32>
    %cst_56 = arith.constant dense<0xFF800000> : vector<16xf32>
    %149 = vector.multi_reduction <maximumf>, %148, %cst_56 [1] : vector<16x16xf32> to vector<16xf32>
    %150 = vector.shape_cast %149 : vector<16xf32> to vector<16x1xf32>
    %151 = vector.broadcast %150 : vector<16x1xf32> to vector<16x16xf32>
    %152 = arith.subf %148, %151 : vector<16x16xf32>
    %153 = math.exp %152 : vector<16x16xf32>
    %cst_57 = arith.constant dense<0.000000e+00> : vector<16xf32>
    %154 = vector.multi_reduction <add>, %153, %cst_57 [1] : vector<16x16xf32> to vector<16xf32>
    %155 = vector.shape_cast %154 : vector<16xf32> to vector<16x1xf32>
    %156 = vector.broadcast %155 : vector<16x1xf32> to vector<16x16xf32>
    %157 = arith.divf %153, %156 : vector<16x16xf32>
    %cst_58 = arith.constant dense<0.000000e+00> : vector<16x8xf32>
    %158 = tpu.matmul %157, %146, %cst_58 {dimension_numbers = #tpu.dot_dimension_numbers<[1], [0], [0], [1], [0, 0, 1, 1], [], []>} : vector<16x16xf32>, vector<16x8xf32>, vector<16x8xf32> -> vector<16x8xf32>
    %159 = vector.extract_strided_slice %143 {offsets = [0, 8], sizes = [16, 8], strides = [1, 1]} : vector<16x96xf32> to vector<16x8xf32>
    %160 = vector.extract_strided_slice %143 {offsets = [0, 40], sizes = [16, 8], strides = [1, 1]} : vector<16x96xf32> to vector<16x8xf32>
    %161 = vector.extract_strided_slice %143 {offsets = [0, 72], sizes = [16, 8], strides = [1, 1]} : vector<16x96xf32> to vector<16x8xf32>
    %cst_59 = arith.constant dense<0.000000e+00> : vector<16x16xf32>
    %162 = tpu.matmul %159, %160, %cst_59 {dimension_numbers = #tpu.dot_dimension_numbers<[1], [1], [0], [0], [0, 0, 1, 0], [], []>} : vector<16x8xf32>, vector<16x8xf32>, vector<16x16xf32> -> vector<16x16xf32>
    %163 = arith.addf %162, %1 : vector<16x16xf32>
    %cst_60 = arith.constant dense<0xFF800000> : vector<16xf32>
    %164 = vector.multi_reduction <maximumf>, %163, %cst_60 [1] : vector<16x16xf32> to vector<16xf32>
    %165 = vector.shape_cast %164 : vector<16xf32> to vector<16x1xf32>
    %166 = vector.broadcast %165 : vector<16x1xf32> to vector<16x16xf32>
    %167 = arith.subf %163, %166 : vector<16x16xf32>
    %168 = math.exp %167 : vector<16x16xf32>
    %cst_61 = arith.constant dense<0.000000e+00> : vector<16xf32>
    %169 = vector.multi_reduction <add>, %168, %cst_61 [1] : vector<16x16xf32> to vector<16xf32>
    %170 = vector.shape_cast %169 : vector<16xf32> to vector<16x1xf32>
    %171 = vector.broadcast %170 : vector<16x1xf32> to vector<16x16xf32>
    %172 = arith.divf %168, %171 : vector<16x16xf32>
    %cst_62 = arith.constant dense<0.000000e+00> : vector<16x8xf32>
    %173 = tpu.matmul %172, %161, %cst_62 {dimension_numbers = #tpu.dot_dimension_numbers<[1], [0], [0], [1], [0, 0, 1, 1], [], []>} : vector<16x16xf32>, vector<16x8xf32>, vector<16x8xf32> -> vector<16x8xf32>
    %174 = vector.extract_strided_slice %143 {offsets = [0, 16], sizes = [16, 8], strides = [1, 1]} : vector<16x96xf32> to vector<16x8xf32>
    %175 = vector.extract_strided_slice %143 {offsets = [0, 48], sizes = [16, 8], strides = [1, 1]} : vector<16x96xf32> to vector<16x8xf32>
    %176 = vector.extract_strided_slice %143 {offsets = [0, 80], sizes = [16, 8], strides = [1, 1]} : vector<16x96xf32> to vector<16x8xf32>
    %cst_63 = arith.constant dense<0.000000e+00> : vector<16x16xf32>
    %177 = tpu.matmul %174, %175, %cst_63 {dimension_numbers = #tpu.dot_dimension_numbers<[1], [1], [0], [0], [0, 0, 1, 0], [], []>} : vector<16x8xf32>, vector<16x8xf32>, vector<16x16xf32> -> vector<16x16xf32>
    %178 = arith.addf %177, %1 : vector<16x16xf32>
    %cst_64 = arith.constant dense<0xFF800000> : vector<16xf32>
    %179 = vector.multi_reduction <maximumf>, %178, %cst_64 [1] : vector<16x16xf32> to vector<16xf32>
    %180 = vector.shape_cast %179 : vector<16xf32> to vector<16x1xf32>
    %181 = vector.broadcast %180 : vector<16x1xf32> to vector<16x16xf32>
    %182 = arith.subf %178, %181 : vector<16x16xf32>
    %183 = math.exp %182 : vector<16x16xf32>
    %cst_65 = arith.constant dense<0.000000e+00> : vector<16xf32>
    %184 = vector.multi_reduction <add>, %183, %cst_65 [1] : vector<16x16xf32> to vector<16xf32>
    %185 = vector.shape_cast %184 : vector<16xf32> to vector<16x1xf32>
    %186 = vector.broadcast %185 : vector<16x1xf32> to vector<16x16xf32>
    %187 = arith.divf %183, %186 : vector<16x16xf32>
    %cst_66 = arith.constant dense<0.000000e+00> : vector<16x8xf32>
    %188 = tpu.matmul %187, %176, %cst_66 {dimension_numbers = #tpu.dot_dimension_numbers<[1], [0], [0], [1], [0, 0, 1, 1], [], []>} : vector<16x16xf32>, vector<16x8xf32>, vector<16x8xf32> -> vector<16x8xf32>
    %189 = vector.extract_strided_slice %143 {offsets = [0, 24], sizes = [16, 8], strides = [1, 1]} : vector<16x96xf32> to vector<16x8xf32>
    %190 = vector.extract_strided_slice %143 {offsets = [0, 56], sizes = [16, 8], strides = [1, 1]} : vector<16x96xf32> to vector<16x8xf32>
    %191 = vector.extract_strided_slice %143 {offsets = [0, 88], sizes = [16, 8], strides = [1, 1]} : vector<16x96xf32> to vector<16x8xf32>
    %cst_67 = arith.constant dense<0.000000e+00> : vector<16x16xf32>
    %192 = tpu.matmul %189, %190, %cst_67 {dimension_numbers = #tpu.dot_dimension_numbers<[1], [1], [0], [0], [0, 0, 1, 0], [], []>} : vector<16x8xf32>, vector<16x8xf32>, vector<16x16xf32> -> vector<16x16xf32>
    %193 = arith.addf %192, %1 : vector<16x16xf32>
    %cst_68 = arith.constant dense<0xFF800000> : vector<16xf32>
    %194 = vector.multi_reduction <maximumf>, %193, %cst_68 [1] : vector<16x16xf32> to vector<16xf32>
    %195 = vector.shape_cast %194 : vector<16xf32> to vector<16x1xf32>
    %196 = vector.broadcast %195 : vector<16x1xf32> to vector<16x16xf32>
    %197 = arith.subf %193, %196 : vector<16x16xf32>
    %198 = math.exp %197 : vector<16x16xf32>
    %cst_69 = arith.constant dense<0.000000e+00> : vector<16xf32>
    %199 = vector.multi_reduction <add>, %198, %cst_69 [1] : vector<16x16xf32> to vector<16xf32>
    %200 = vector.shape_cast %199 : vector<16xf32> to vector<16x1xf32>
    %201 = vector.broadcast %200 : vector<16x1xf32> to vector<16x16xf32>
    %202 = arith.divf %198, %201 : vector<16x16xf32>
    %cst_70 = arith.constant dense<0.000000e+00> : vector<16x8xf32>
    %203 = tpu.matmul %202, %191, %cst_70 {dimension_numbers = #tpu.dot_dimension_numbers<[1], [0], [0], [1], [0, 0, 1, 1], [], []>} : vector<16x16xf32>, vector<16x8xf32>, vector<16x8xf32> -> vector<16x8xf32>
    %204 = tpu.concatenate %158, %173, %188, %203 in 1 : vector<16x8xf32>, vector<16x8xf32>, vector<16x8xf32>, vector<16x8xf32> -> vector<16x32xf32>
    %c280 = arith.constant 280 : index
    %c0_71 = arith.constant 0 : index
    %205 = vector.load %arg2[%c280, %c0_71] : memref<408x128xf32, #tpu.memory_space<vmem>>, vector<32x32xf32>
    %cst_72 = arith.constant dense<0.000000e+00> : vector<16x32xf32>
    %206 = tpu.matmul %204, %205, %cst_72 {dimension_numbers = #tpu.dot_dimension_numbers<[1], [0], [0], [1], [0, 0, 1, 1], [], []>} : vector<16x32xf32>, vector<32x32xf32>, vector<16x32xf32> -> vector<16x32xf32>
    %207 = arith.addf %206, %135 : vector<16x32xf32>
    %cst_73 = arith.constant dense<0.000000e+00> : vector<16xf32>
    %208 = vector.multi_reduction <add>, %207, %cst_73 [1] : vector<16x32xf32> to vector<16xf32>
    %209 = vector.shape_cast %208 : vector<16xf32> to vector<16x1xf32>
    %cst_74 = arith.constant 3.200000e+01 : f32
    %210 = vector.broadcast %cst_74 : f32 to vector<16x1xf32>
    %211 = arith.divf %209, %210 : vector<16x1xf32>
    %212 = vector.broadcast %211 : vector<16x1xf32> to vector<16x32xf32>
    %213 = arith.subf %207, %212 : vector<16x32xf32>
    %214 = arith.mulf %213, %213 : vector<16x32xf32>
    %cst_75 = arith.constant dense<0.000000e+00> : vector<16xf32>
    %215 = vector.multi_reduction <add>, %214, %cst_75 [1] : vector<16x32xf32> to vector<16xf32>
    %216 = vector.shape_cast %215 : vector<16xf32> to vector<16x1xf32>
    %cst_76 = arith.constant 3.200000e+01 : f32
    %217 = vector.broadcast %cst_76 : f32 to vector<16x1xf32>
    %218 = arith.divf %216, %217 : vector<16x1xf32>
    %219 = vector.broadcast %211 : vector<16x1xf32> to vector<16x32xf32>
    %220 = arith.subf %207, %219 : vector<16x32xf32>
    %cst_77 = arith.constant 9.99999974E-6 : f32
    %221 = vector.broadcast %cst_77 : f32 to vector<16x1xf32>
    %222 = arith.addf %218, %221 : vector<16x1xf32>
    %223 = math.rsqrt %222 : vector<16x1xf32>
    %224 = vector.broadcast %223 : vector<16x1xf32> to vector<16x32xf32>
    %225 = arith.mulf %220, %224 : vector<16x32xf32>
    %226 = vector.broadcast %138 : vector<1x32xf32> to vector<16x32xf32>
    %227 = arith.mulf %225, %226 : vector<16x32xf32>
    %228 = vector.broadcast %139 : vector<1x32xf32> to vector<16x32xf32>
    %229 = arith.addf %227, %228 : vector<16x32xf32>
    %c312 = arith.constant 312 : index
    %c0_78 = arith.constant 0 : index
    %230 = vector.load %arg2[%c312, %c0_78] : memref<408x128xf32, #tpu.memory_space<vmem>>, vector<32x64xf32>
    %c344 = arith.constant 344 : index
    %c0_79 = arith.constant 0 : index
    %231 = vector.load %arg2[%c344, %c0_79] : memref<408x128xf32, #tpu.memory_space<vmem>>, vector<64x32xf32>
    %cst_80 = arith.constant dense<0.000000e+00> : vector<16x64xf32>
    %232 = tpu.matmul %229, %230, %cst_80 {dimension_numbers = #tpu.dot_dimension_numbers<[1], [0], [0], [1], [0, 0, 1, 1], [], []>} : vector<16x32xf32>, vector<32x64xf32>, vector<16x64xf32> -> vector<16x64xf32>
    %233 = vector.broadcast %136 : vector<1x64xf32> to vector<16x64xf32>
    %234 = arith.addf %232, %233 : vector<16x64xf32>
    %cst_81 = arith.constant 0.000000e+00 : f32
    %235 = vector.broadcast %cst_81 : f32 to vector<16x64xf32>
    %236 = arith.maximumf %234, %235 : vector<16x64xf32>
    %cst_82 = arith.constant dense<0.000000e+00> : vector<16x32xf32>
    %237 = tpu.matmul %236, %231, %cst_82 {dimension_numbers = #tpu.dot_dimension_numbers<[1], [0], [0], [1], [0, 0, 1, 1], [], []>} : vector<16x64xf32>, vector<64x32xf32>, vector<16x32xf32> -> vector<16x32xf32>
    %238 = vector.broadcast %137 : vector<1x32xf32> to vector<16x32xf32>
    %239 = arith.addf %237, %238 : vector<16x32xf32>
    %240 = arith.addf %239, %229 : vector<16x32xf32>
    %cst_83 = arith.constant dense<0.000000e+00> : vector<16xf32>
    %241 = vector.multi_reduction <add>, %240, %cst_83 [1] : vector<16x32xf32> to vector<16xf32>
    %242 = vector.shape_cast %241 : vector<16xf32> to vector<16x1xf32>
    %cst_84 = arith.constant 3.200000e+01 : f32
    %243 = vector.broadcast %cst_84 : f32 to vector<16x1xf32>
    %244 = arith.divf %242, %243 : vector<16x1xf32>
    %245 = vector.broadcast %244 : vector<16x1xf32> to vector<16x32xf32>
    %246 = arith.subf %240, %245 : vector<16x32xf32>
    %247 = arith.mulf %246, %246 : vector<16x32xf32>
    %cst_85 = arith.constant dense<0.000000e+00> : vector<16xf32>
    %248 = vector.multi_reduction <add>, %247, %cst_85 [1] : vector<16x32xf32> to vector<16xf32>
    %249 = vector.shape_cast %248 : vector<16xf32> to vector<16x1xf32>
    %cst_86 = arith.constant 3.200000e+01 : f32
    %250 = vector.broadcast %cst_86 : f32 to vector<16x1xf32>
    %251 = arith.divf %249, %250 : vector<16x1xf32>
    %252 = vector.broadcast %244 : vector<16x1xf32> to vector<16x32xf32>
    %253 = arith.subf %240, %252 : vector<16x32xf32>
    %cst_87 = arith.constant 9.99999974E-6 : f32
    %254 = vector.broadcast %cst_87 : f32 to vector<16x1xf32>
    %255 = arith.addf %251, %254 : vector<16x1xf32>
    %256 = math.rsqrt %255 : vector<16x1xf32>
    %257 = vector.broadcast %256 : vector<16x1xf32> to vector<16x32xf32>
    %258 = arith.mulf %253, %257 : vector<16x32xf32>
    %259 = vector.broadcast %140 : vector<1x32xf32> to vector<16x32xf32>
    %260 = arith.mulf %258, %259 : vector<16x32xf32>
    %261 = vector.broadcast %141 : vector<1x32xf32> to vector<16x32xf32>
    %262 = arith.addf %260, %261 : vector<16x32xf32>
    %c56 = arith.constant 56 : index
    %c0_88 = arith.constant 0 : index
    %263 = vector.load %arg2[%c56, %c0_88] : memref<408x128xf32, #tpu.memory_space<vmem>>, vector<32x128xf32>
    %c41 = arith.constant 41 : index
    %c0_89 = arith.constant 0 : index
    %264 = vector.load %arg2[%c41, %c0_89] : memref<408x128xf32, #tpu.memory_space<vmem>>, vector<1x128xf32>
    %cst_90 = arith.constant dense<0.000000e+00> : vector<16x128xf32>
    %265 = tpu.matmul %262, %263, %cst_90 {dimension_numbers = #tpu.dot_dimension_numbers<[1], [0], [0], [1], [0, 0, 1, 1], [], []>} : vector<16x32xf32>, vector<32x128xf32>, vector<16x128xf32> -> vector<16x128xf32>
    %266 = vector.broadcast %264 : vector<1x128xf32> to vector<16x128xf32>
    %267 = arith.addf %265, %266 : vector<16x128xf32>
    %c0_91 = arith.constant 0 : index
    %c0_92 = arith.constant 0 : index
    %268 = vector.load %arg3[%c0_91, %c0_92] : memref<16x128xf32, #tpu.memory_space<vmem>>, vector<16x128xf32>
    tpu.vector_store %arg3[%c0_91, %c0_92], %267 {strides = array<i32>} : memref<16x128xf32, #tpu.memory_space<vmem>>, vector<16x128xf32>,
    return
  }
  func.func @transform_0(%arg0: i32) -> (i32, i32) {
    %c0_i32 = arith.constant 0 : i32
    %c0_i32_0 = arith.constant 0 : i32
    %c0_i32_1 = arith.constant 0 : i32
    return %c0_i32, %c0_i32_0 : i32, i32
  }
  func.func @transform_1(%arg0: i32) -> (i32, i32) {
    %c0_i32 = arith.constant 0 : i32
    %c0_i32_0 = arith.constant 0 : i32
    %c0_i32_1 = arith.constant 0 : i32
    return %c0_i32, %c0_i32_0 : i32, i32
  }
  func.func @transform_2(%arg0: i32) -> (i32, i32) {
    %c0_i32 = arith.constant 0 : i32
    %c0_i32_0 = arith.constant 0 : i32
    %c0_i32_1 = arith.constant 0 : i32
    return %c0_i32, %c0_i32_0 : i32, i32
  }
}

</mosaic_0001>

<bundles_post_ra>
// kernel: tpu_custom_call.1
= control target key start
LH: loop header
LB: loop body
LE: loop exit
PB: predicated region body
PF: predicated region fallthrough
CT: control target
= control target key end

     0   :  { %7 = vsyncpa [#allocation3], 0  ;;  %s3974_s0 = inlined_call_operand.vmem [shape: f32[16,4], index: 0, kind: input, shape index: {}]   ;;  %s3975_s1 = inlined_call_operand.hbm [shape: f32[408,128], index: 1, kind: input, shape index: {}]   ;;  %s3976_s2 = inlined_call_operand.hbm [shape: f32[16,128], index: 2, kind: output, shape index: {}]  }
   0x1   :  { %8 = vsyncpa [#allocation4], 0  ;;  %s3612_s9 = smov [#allocation2]   ;;  %s3564_s13 = scalar_lea.hbm %s3975_s1, 6528 }
   0x2   :  { %s16_s10 = sshll.u32 %s3612_s9, 4  ;;  %p3565_p0 = scmp.ne.s32.totalorder %s3975_s1, %s3564_s13  ;;  %s17_s10 = int_to_ptr.vmem [resolvable:$true] %s16_s10 }
   0x3   :  { %p3568_p1 = scmp.lt.u32.totalorder %s3564_s13, %s3975_s1 }
   0x5   :  { %p3570_p2 = pnand %p3568_p1, %p3565_p0 }
   0x7   :  { %3573 = shalt.err (!%p3570_p2)
}
   0x8   :  { %s3574_s18 = scalar_lea.vmem %s17_s10, 6528  ;;  %p3579_p4 = scmp.lt.s32.totalorder %s17_s10, %s17_s10 }
   0x9   :  { %p3575_p3 = scmp.ne.s32.totalorder %s17_s10, %s3574_s18  ;;  %p3580_p5 = scmp.lt.s32.totalorder %s3574_s18, %s3574_s18 }
   0xb   :  { %p3581_p6 = por %p3580_p5, %p3579_p4 }
   0xd   :  { %p3582_p7 = pnand %p3581_p6, %p3575_p3 }
   0xf   :  { %3585 = shalt.err (!%p3582_p7)
}
  0x10   :  { %s3613_s19 = smov 128   ;;  %s3614_s20 = smov 8  }
  0x11   :  { %22 = dma.hbm_to_vmem [thread:$0]  %s3975_s1, 6528, %s17_s10, [#allocation3], %s3613_s19, %s3613_s19, %s3614_s20  }
  0x12   :  { %3608 = dma.done.wait [#allocation3], 6528  }
  0x13   :  { %3609 = vsyncadd [#allocation3], 4294960768  ;;  %vm45_vm0 = vcmask 1043456   ;;  %vm38_vm1 = vcmask 31744   ;;  %v30_v0 = vld [vmem:[#allocation2 + $0x20] sm:$0xf] }
  0x14   :  { %v32_v1 = vld [vmem:[%s3974_s0] sm:$0xff]  ;;  %v33_v2 = vld [vmem:[%s3974_s0 + $0x8] sm:$0xff]  ;;  %2985 = vmatprep.subr.msk.mxu0 %vm45_vm0, %v30_v0  ;;  %v132_v3 = vld [vmem:[#allocation2 + $0x58] sm:$0xff]  ;;  %vm136_vm2 = vcmask 261120   ;;  %vm224_vm3 = vcmask 64512   ;;  %s3615_s0 = smov 96  }
  0x15   :  { %2987 = vmatprep.mubr.msk.f32.mxu0 %vm38_vm1, %v32_v1  ;;  %v133_v4 = vld [vmem:[#allocation2 + $0x60] sm:$0xff]  ;;  %2986 = vmatpush3.msk.msra.mxu0 %vm45_vm0, %v30_v0  ;;  %v134_v6 = vld [vmem:[#allocation2 + $0x68] sm:$0xff]  ;;  %v135_v7 = vld [vmem:[#allocation2 + $0x70] sm:$0xff]  ;;  %vm308_vm5 = vcmask 130048   ;;  %s3616_s1 = smov 64   ;;  %s3617_s27 = smov 88  }
  0x16   :  { %v3217_v5 = vpack.c.bf16 %v133_v4, %v132_v3  ;;  %2988 = vmatmul.mubr.msk.f32.vlgmr.msra.gmra.mrb[0].mxu0 %vm38_vm1, %v33_v2  ;;  %v3221_v8 = vpack.c.bf16 %v135_v7, %v134_v6  ;;  %v2773_v9 = vld [vmem:[#allocation2 + $0x28] ss:$0 sm:$0xff]  ;;  %v26_v13 = vld [vmem:[#allocation2] sm:$0xff]  ;;  %vm3687_vm4 = vmpackc.low %vm224_vm3, %vm224_vm3  ;;  %s3618_s28 = smov 120   ;;  %s3619_s29 = smov 56   ;;  %vm1046_vm6 = vcmask 195584  }
  0x17   :  { %v27_v14 = vld [vmem:[#allocation2 + $0x8] sm:$0xff]  ;;  %v3697_v26 = vld [vmem:[#allocation2 + $0x18] sm:$0xff]  ;;  %v3699_v27 = vld [vmem:[#allocation2 + $0x10] sm:$0xff]  ;;  %s3620_s30 = smov 80   ;;  %s3621_s3 = smov 112   ;;  %vm1276_vm7 = vcmask 523264  }
  0x18   :  { %3218 = vmatprep.subr.bf16.mxu1 %v3217_v5  ;;  %s3622_s4 = smov 72   ;;  %s3623_s5 = smov 104  }
  0x19   :  { %3220 = vmatpush3.bf16.msra.mxu1 %v3217_v5  ;;  %s3624_s6 = smov 48   ;;  %s3625_s7 = smov 40  }
  0x1a   :  { %3222 = vmatprep.subr.bf16.mxu1 %v3221_v8  ;;  %s3626_s8 = smov 16   ;;  %s3627_s9 = smov 24  }
  0x1b   :  { %s3628_s10 = smov [#allocation5]  }
  0x1c   :  { %s2761_s11 = sshll.u32 %s3628_s10, 4  ;;  %s2762_s11 = int_to_ptr.vmem [resolvable:$true] %s2761_s11 }
  0x1d   :  { %3224 = vmatpush3.bf16.msra.mxu1 %v3221_v8  ;;  %s3586_s12 = scalar_lea.vmem %s2762_s11, 256  ;;  %p3591_p9 = scmp.lt.s32.totalorder %s2762_s11, %s2762_s11 }
  0x1e   :  { %p3587_p8 = scmp.ne.s32.totalorder %s2762_s11, %s3586_s12  ;;  %p3592_p10 = scmp.lt.s32.totalorder %s3586_s12, %s3586_s12 }
  0x20   :  { %p3593_p11 = por %p3592_p10, %p3591_p9 }
  0x22   :  { %p3594_p12 = pnand %p3593_p11, %p3587_p8 }
  0xe9   :  { %v2989_v10 = vpop.f32.mrb[0].mxu0 }
  0xea   :  { %v121_v11 = vadd.f32 %v2989_v10, %v2773_v9  ;;  %v115_v12 = vpop.f32.mrb[1].mxu0 }
  0xeb   :  { %v116_v15 = vadd.f32 %v2773_v9, %v115_v12 }
  0xec   :  { %v3667_v17 = vadd.f32 %v121_v11, %v27_v14 }
  0xed   :  { %v3665_v16 = vadd.f32 %v116_v15, %v26_v13 }
  0xef   :  { %2998 = vmatprep.mubr.msk.f32.mxu1 %vm136_vm2, %v3665_v16 }
  0xf0   :  { %2999 = vmatmul.mubr.msk.f32.vlgmr.msra.gmra.mrb[0].mxu1 %vm136_vm2, %v3667_v17 }
 0x1c3   :  { %v3673_v18 = vpop.f32.mrb[0].mxu1 }
 0x1c4   :  { %v3675_v19 = vpop.f32.mrb[1].mxu1 }
 0x1c5   :  { %3005 = vmatprep.mubr.msk.f32.mxu0 %vm224_vm3, %v3675_v19  ;;  %v3681_v20 = vpack.i.bf16 %v3673_v18, %v3675_v19 }
 0x1c7   :  { %3403 = vrot.lane.b32.xlu0 %v3681_v20, %s3615_s0 }
 0x239   :  { %v3404_v21 = vpop.permute.xlu0 %3403 }
 0x23a   :  { %v3406_v22 = vunpack.i.h.bf16 %v3404_v21  ;;  %v3405_v23 = vunpack.i.l.bf16 %v3404_v21 }
 0x23c   :  { %v3225_v25 = vpack.c.bf16 %v3406_v22, %v3405_v23 }
 0x23e   :  { %3227 = vmatprep.subr.msk.bf16.mxu0 %vm3687_vm4, %v3225_v25 }
 0x23f   :  { %3230 = vmatpush3.bf16.xpose.msk.msra.mxu0 %vm3687_vm4, %v3225_v25 }
 0x246   :  { %3006 = vmatmul.mubr.msk.f32.vlgmr.msra.gmra.mrb[2].mxu0 %vm224_vm3, %v3673_v18 }
 0x319   :  { %v3007_v28 = vpop.f32.mrb[2].mxu0 }
 0x31a   :  { %v305_v29 = vadd.f32 %v3007_v28, %v3697_v26  ;;  %v299_v30 = vpop.f32.mrb[3].mxu0 }
 0x31b   :  { %v300_v31 = vadd.f32 %v299_v30, %v3699_v27 }
 0x31c   :  { %v312_v32 = vsel %vm308_vm5, %v305_v29, -inf }
 0x31d   :  { %313 = vmax.xlane.f32.xlu1 %v312_v32  ;;  %v309_v33 = vsel %vm308_vm5, %v300_v31, -inf }
 0x31e   :  { %310 = vmax.xlane.f32.xlu0 %v309_v33 }
 0x32e   :  { %3408 = vrot.lane.b32.xlu1 %v3681_v20, %s3616_s1 }
 0x332   :  { %3413 = vrot.lane.b32.xlu1 %v3681_v20, %s3617_s27 }
 0x334   :  { %420 = vrot.lane.b32.xlu0 %v3673_v18, %s3618_s28 }
 0x3aa   :  { %v314_v34 = vpop.xlane.xlu1 %313 }
 0x3ab   :  { %v316_v35 = vsub.f32 %v305_v29, %v314_v34  ;;  %v311_v36 = vpop.xlane.xlu0 %310 }
 0x3ac   :  { %v315_v37 = vsub.f32 %v300_v31, %v311_v36 }
 0x3ad   :  { %v319_v38 = vmul.f32 1.442695, %v316_v35 }
 0x3ae   :  { %v317_v39 = vmul.f32 1.442695, %v315_v37  ;;  %v3409_v40 = vpop.permute.xlu1 %3408 }
 0x3af   :  { %3482 = vpow2.f32 %v319_v38  ;;  %v3411_v41 = vunpack.i.h.bf16 %v3409_v40  ;;  %v3410_v42 = vunpack.i.l.bf16 %v3409_v40  ;;  %v421_v59 = vpop.permute.xlu0 %420 }
 0x3b0   :  { %3484 = vpow2.f32 %v317_v39 }
 0x3b1   :  { %v3231_v43 = vpack.c.bf16 %v3411_v41, %v3410_v42 }
 0x3b2   :  { %v3414_v44 = vpop.permute.xlu1 %3413 }
 0x3b3   :  { %v3416_v45 = vunpack.i.h.bf16 %v3414_v44  ;;  %v3415_v46 = vunpack.i.l.bf16 %v3414_v44  ;;  %3232 = vmatprep.subr.bf16.mxu0 %v3231_v43 }
 0x3b4   :  { %3234 = vmatpush3.bf16.msra.mxu0 %v3231_v43 }
 0x3b5   :  { %v3235_v47 = vpack.c.bf16 %v3416_v45, %v3415_v46 }
 0x3b7   :  { %3237 = vmatprep.subr.msk.bf16.mxu0 %vm3687_vm4, %v3235_v47 }
 0x3b9   :  { %v3483_v48 = vpop.eup %3482 }
 0x3ba   :  { %v324_v49 = vsel %vm308_vm5, %v3483_v48, 0.0  ;;  %v3485_v50 = vpop.eup %3484 }
 0x3bb   :  { %325 = vadd.xlane.f32.xlu1 %v324_v49  ;;  %v321_v51 = vsel %vm308_vm5, %v3485_v50, 0.0 }
 0x3bf   :  { %322 = vadd.xlane.f32.xlu1 %v321_v51 }
 0x3d0   :  { %418 = vrot.lane.b32.xlu1 %v3675_v19, %s3618_s28 }
 0x448   :  { %v326_v52 = vpop.xlane.xlu1 %325 }
 0x449   :  { %3486 = vrcp.f32 %v326_v52 }
 0x44c   :  { %v323_v53 = vpop.xlane.xlu1 %322 }
 0x44d   :  { %3488 = vrcp.f32 %v323_v53 }
 0x450   :  { %v419_v58 = vpop.permute.xlu1 %418 }
 0x453   :  { %v3487_v54 = vpop.eup %3486 }
 0x454   :  { %v330_v57 = vmul.f32 %v3487_v54, %v3483_v48 }
 0x457   :  { %v3489_v55 = vpop.eup %3488 }
 0x458   :  { %v328_v56 = vmul.f32 %v3489_v55, %v3485_v50 }
 0x45a   :  { %3012 = vmatprep.mubr.msk.f32.mxu0 %vm308_vm5, %v328_v56 }
 0x45b   :  { %3013 = vmatmul.mubr.msk.f32.vlgmr.msra.gmra.mrb[4].mxu0 %vm308_vm5, %v330_v57 }
 0x45c   :  { %3240 = vmatpush3.bf16.xpose.msk.msra.mxu0 %vm3687_vm4, %v3235_v47  ;;  %3019 = vmatprep.mubr.msk.f32.mxu0 %vm224_vm3, %v419_v58 }
 0x463   :  { %3020 = vmatmul.mubr.msk.f32.vlgmr.msra.gmra.mrb[6].mxu0 %vm224_vm3, %v421_v59 }
 0x52e   :  { %v3723_v60 = vpop.f32.mrb[4].mxu0 }
 0x52f   :  { %v3725_v61 = vpop.f32.mrb[5].mxu0 }
 0x536   :  { %v3021_v62 = vpop.f32.mrb[6].mxu0 }
 0x537   :  { %v506_v63 = vadd.f32 %v3021_v62, %v3697_v26  ;;  %v500_v0 = vpop.f32.mrb[7].mxu0 }
 0x538   :  { %v501_v1 = vadd.f32 %v500_v0, %v3699_v27 }
 0x539   :  { %v512_v2 = vsel %vm308_vm5, %v506_v63, -inf }
 0x53a   :  { %513 = vmax.xlane.f32.xlu0 %v512_v2  ;;  %v509_v3 = vsel %vm308_vm5, %v501_v1, -inf }
 0x53b   :  { %510 = vmax.xlane.f32.xlu1 %v509_v3 }
 0x54c   :  { %3418 = vrot.lane.b32.xlu1 %v3681_v20, %s3619_s29 }
 0x550   :  { %3423 = vrot.lane.b32.xlu0 %v3681_v20, %s3620_s30  ;;  %618 = vrot.lane.b32.xlu1 %v3675_v19, %s3621_s3 }
 0x5c7   :  { %v514_v4 = vpop.xlane.xlu0 %513 }
 0x5c8   :  { %v516_v5 = vsub.f32 %v506_v63, %v514_v4  ;;  %v511_v6 = vpop.xlane.xlu1 %510 }
 0x5c9   :  { %v515_v7 = vsub.f32 %v501_v1, %v511_v6 }
 0x5ca   :  { %v519_v8 = vmul.f32 1.442695, %v516_v5 }
 0x5cb   :  { %v517_v9 = vmul.f32 1.442695, %v515_v7  ;;  %v3424_v10 = vpop.permute.xlu0 %3423 }
 0x5cc   :  { %3490 = vpow2.f32 %v519_v8  ;;  %v3419_v11 = vpop.permute.xlu1 %3418  ;;  %v3426_v12 = vunpack.i.h.bf16 %v3424_v10  ;;  %v3425_v13 = vunpack.i.l.bf16 %v3424_v10 }
 0x5cd   :  { %v3421_v14 = vunpack.i.h.bf16 %v3419_v11  ;;  %v3420_v15 = vunpack.i.l.bf16 %v3419_v11  ;;  %3492 = vpow2.f32 %v517_v9 }
 0x5ce   :  { %v3245_v22 = vpack.c.bf16 %v3426_v12, %v3425_v13 }
 0x5cf   :  { %v3241_v21 = vpack.c.bf16 %v3421_v14, %v3420_v15 }
 0x5d0   :  { %v619_v30 = vpop.permute.xlu1 %618 }
 0x5d1   :  { %3242 = vmatprep.subr.bf16.mxu1 %v3241_v21 }
 0x5d2   :  { %3244 = vmatpush3.bf16.msra.mxu1 %v3241_v21 }
 0x5d3   :  { %3247 = vmatprep.subr.msk.bf16.mxu1 %vm3687_vm4, %v3245_v22 }
 0x5d6   :  { %v3491_v23 = vpop.eup %3490 }
 0x5d7   :  { %v524_v25 = vsel %vm308_vm5, %v3491_v23, 0.0  ;;  %v3493_v28 = vpop.eup %3492 }
 0x5d8   :  { %525 = vadd.xlane.f32.xlu1 %v524_v25  ;;  %v521_v29 = vsel %vm308_vm5, %v3493_v28, 0.0 }
 0x5dc   :  { %522 = vadd.xlane.f32.xlu1 %v521_v29 }
 0x5ed   :  { %620 = vrot.lane.b32.xlu1 %v3673_v18, %s3621_s3 }
 0x665   :  { %v526_v31 = vpop.xlane.xlu1 %525 }
 0x666   :  { %3494 = vrcp.f32 %v526_v31 }
 0x669   :  { %v523_v32 = vpop.xlane.xlu1 %522 }
 0x66a   :  { %3496 = vrcp.f32 %v523_v32 }
 0x66d   :  { %v621_v37 = vpop.permute.xlu1 %620 }
 0x670   :  { %v3495_v33 = vpop.eup %3494 }
 0x671   :  { %v530_v36 = vmul.f32 %v3495_v33, %v3491_v23 }
 0x674   :  { %v3497_v34 = vpop.eup %3496 }
 0x675   :  { %v528_v35 = vmul.f32 %v3497_v34, %v3493_v28 }
 0x677   :  { %3026 = vmatprep.mubr.msk.f32.mxu1 %vm308_vm5, %v528_v35 }
 0x678   :  { %3027 = vmatmul.mubr.msk.f32.vlgmr.msra.gmra.mrb[2].mxu1 %vm308_vm5, %v530_v36 }
 0x679   :  { %3250 = vmatpush3.bf16.xpose.msk.msra.mxu1 %vm3687_vm4, %v3245_v22  ;;  %3033 = vmatprep.mubr.msk.f32.mxu1 %vm224_vm3, %v619_v30 }
 0x680   :  { %3034 = vmatmul.mubr.msk.f32.vlgmr.msra.gmra.mrb[4].mxu1 %vm224_vm3, %v621_v37 }
 0x74b   :  { %v3749_v38 = vpop.f32.mrb[2].mxu1 }
 0x74c   :  { %v3751_v39 = vpop.f32.mrb[3].mxu1 }
 0x753   :  { %v3035_v40 = vpop.f32.mrb[4].mxu1 }
 0x754   :  { %v706_v41 = vadd.f32 %v3035_v40, %v3697_v26  ;;  %v700_v42 = vpop.f32.mrb[5].mxu1 }
 0x755   :  { %v701_v43 = vadd.f32 %v700_v42, %v3699_v27 }
 0x756   :  { %v712_v44 = vsel %vm308_vm5, %v706_v41, -inf }
 0x757   :  { %713 = vmax.xlane.f32.xlu0 %v712_v44  ;;  %v709_v45 = vsel %vm308_vm5, %v701_v43, -inf  ;;  %v1050_v44 = vld [vmem:[#allocation2 + $0x80] sm:$0xff] }
 0x758   :  { %710 = vmax.xlane.f32.xlu1 %v709_v45  ;;  %v1051_v45 = vld [vmem:[#allocation2 + $0x88] sm:$0xff] }
 0x7e4   :  { %v714_v46 = vpop.xlane.xlu0 %713 }
 0x7e5   :  { %v716_v47 = vsub.f32 %v706_v41, %v714_v46  ;;  %v711_v48 = vpop.xlane.xlu1 %710 }
 0x7e6   :  { %v715_v49 = vsub.f32 %v701_v43, %v711_v48 }
 0x7e7   :  { %v719_v50 = vmul.f32 1.442695, %v716_v47  ;;  %v1052_v47 = vld [vmem:[#allocation2 + $0x90] sm:$0xff] }
 0x7e8   :  { %v717_v51 = vmul.f32 1.442695, %v715_v49  ;;  %v3269_v48 = vpack.c.bf16 %v1052_v47, %v1051_v45 }
 0x7e9   :  { %3498 = vpow2.f32 %v719_v50 }
 0x7ea   :  { %3500 = vpow2.f32 %v717_v51 }
 0x7f3   :  { %v3499_v52 = vpop.eup %3498 }
 0x7f4   :  { %v3501_v53 = vpop.eup %3500  ;;  %v724_v54 = vsel %vm308_vm5, %v3499_v52, 0.0 }
 0x7f5   :  { %725 = vadd.xlane.f32.xlu1 %v724_v54  ;;  %v721_v55 = vsel %vm308_vm5, %v3501_v53, 0.0 }
 0x7f6   :  { %722 = vadd.xlane.f32.xlu0 %v721_v55 }
 0x806   :  { %3433 = vrot.lane.b32.xlu1 %v3681_v20, %s3622_s4 }
 0x80a   :  { %818 = vrot.lane.b32.xlu1 %v3675_v19, %s3623_s5 }
 0x80c   :  { %3428 = vrot.lane.b32.xlu0 %v3681_v20, %s3624_s6 }
 0x810   :  { %820 = vrot.lane.b32.xlu0 %v3673_v18, %s3623_s5 }
 0x882   :  { %v726_v56 = vpop.xlane.xlu1 %725 }
 0x883   :  { %3502 = vrcp.f32 %v726_v56  ;;  %v723_v57 = vpop.xlane.xlu0 %722 }
 0x884   :  { %3504 = vrcp.f32 %v723_v57 }
 0x886   :  { %v3434_v58 = vpop.permute.xlu1 %3433 }
 0x887   :  { %v3429_v59 = vpop.permute.xlu0 %3428  ;;  %v3436_v62 = vunpack.i.h.bf16 %v3434_v58  ;;  %v3435_v63 = vunpack.i.l.bf16 %v3434_v58 }
 0x888   :  { %v3431_v0 = vunpack.i.h.bf16 %v3429_v59  ;;  %v3430_v1 = vunpack.i.l.bf16 %v3429_v59 }
 0x889   :  { %v3255_v3 = vpack.c.bf16 %v3436_v62, %v3435_v63 }
 0x88a   :  { %v3251_v2 = vpack.c.bf16 %v3431_v0, %v3430_v1  ;;  %v819_v6 = vpop.permute.xlu1 %818 }
 0x88b   :  { %v821_v7 = vpop.permute.xlu0 %820 }
 0x88c   :  { %3252 = vmatprep.subr.bf16.mxu0 %v3251_v2 }
 0x88d   :  { %v3503_v19 = vpop.eup %3502  ;;  %3254 = vmatpush3.bf16.msra.mxu0 %v3251_v2 }
 0x88e   :  { %v3505_v4 = vpop.eup %3504  ;;  %3257 = vmatprep.subr.msk.bf16.mxu0 %vm3687_vm4, %v3255_v3  ;;  %v730_v5 = vmul.f32 %v3503_v19, %v3499_v52 }
 0x88f   :  { %v728_v18 = vmul.f32 %v3505_v4, %v3501_v53 }
 0x891   :  { %3040 = vmatprep.mubr.msk.f32.mxu0 %vm308_vm5, %v728_v18 }
 0x892   :  { %3041 = vmatmul.mubr.msk.f32.vlgmr.msra.gmra.mrb[8].mxu0 %vm308_vm5, %v730_v5 }
 0x893   :  { %3047 = vmatprep.mubr.msk.f32.mxu0 %vm224_vm3, %v819_v6 }
 0x896   :  { %3260 = vmatpush3.bf16.xpose.msk.msra.mxu0 %vm3687_vm4, %v3255_v3 }
 0x89d   :  { %3048 = vmatmul.mubr.msk.f32.vlgmr.msra.gmra.mrb[10].mxu0 %vm224_vm3, %v821_v7 }
 0x965   :  { %v3042_v8 = vpop.f32.mrb[8].mxu0 }
 0x966   :  { %v809_v9 = vpop.f32.mrb[9].mxu0 }
 0x970   :  { %v3049_v10 = vpop.f32.mrb[10].mxu0 }
 0x971   :  { %v906_v11 = vadd.f32 %v3049_v10, %v3697_v26  ;;  %v900_v12 = vpop.f32.mrb[11].mxu0 }
 0x972   :  { %v901_v13 = vadd.f32 %v900_v12, %v3699_v27  ;;  %v1174_v12 = vld [vmem:[#allocation2 + $0xa0] sm:$0xff] }
 0x973   :  { %v912_v14 = vsel %vm308_vm5, %v906_v11, -inf }
 0x974   :  { %913 = vmax.xlane.f32.xlu0 %v912_v14  ;;  %v909_v15 = vsel %vm308_vm5, %v901_v13, -inf  ;;  %v1175_v14 = vld [vmem:[#allocation2 + $0xa8] sm:$0xff] }
 0x975   :  { %910 = vmax.xlane.f32.xlu1 %v909_v15  ;;  %v1176_v15 = vld [vmem:[#allocation2 + $0xb0] sm:$0xff] }
 0xa01   :  { %v914_v21 = vpop.xlane.xlu0 %913 }
 0xa02   :  { %v916_v22 = vsub.f32 %v906_v11, %v914_v21  ;;  %v911_v23 = vpop.xlane.xlu1 %910  ;;  %v3277_v21 = vpack.c.bf16 %v1176_v15, %v1175_v14  ;;  %v1407_v14 = vld [vmem:[#allocation2 + $0x110] sm:$0xff] }
 0xa03   :  { %v915_v25 = vsub.f32 %v901_v13, %v911_v23  ;;  %v1178_v23 = vld [vmem:[#allocation2 + $0xc0] sm:$0xff] }
 0xa04   :  { %v919_v28 = vmul.f32 1.442695, %v916_v22  ;;  %v1177_v22 = vld [vmem:[#allocation2 + $0xb8] sm:$0xff] }
 0xa05   :  { %v917_v29 = vmul.f32 1.442695, %v915_v25  ;;  %v1179_v25 = vld [vmem:[#allocation2 + $0xc8] sm:$0xff] }
 0xa06   :  { %3506 = vpow2.f32 %v919_v28  ;;  %v3281_v28 = vpack.c.bf16 %v1178_v23, %v1177_v22 }
 0xa07   :  { %3508 = vpow2.f32 %v917_v29  ;;  %v1180_v29 = vld [vmem:[#allocation2 + $0xd0] sm:$0xff] }
 0xa10   :  { %v3507_v30 = vpop.eup %3506 }
 0xa11   :  { %v3509_v31 = vpop.eup %3508  ;;  %v924_v32 = vsel %vm308_vm5, %v3507_v30, 0.0 }
 0xa12   :  { %925 = vadd.xlane.f32.xlu1 %v924_v32  ;;  %v921_v33 = vsel %vm308_vm5, %v3509_v31, 0.0  ;;  %v1182_v32 = vld [vmem:[#allocation2 + $0xe0] sm:$0xff] }
 0xa13   :  { %922 = vadd.xlane.f32.xlu0 %v921_v33 }
 0xa23   :  { %1020 = vrot.lane.b32.xlu1 %v3751_v39, %s3614_s20 }
 0xa27   :  { %1022 = vrot.lane.b32.xlu1 %v3749_v38, %s3614_s20 }
 0xa29   :  { %3438 = vrot.lane.b32.xlu0 %v3681_v20, %s3625_s7  ;;  %v1049_v20 = vld [vmem:[#allocation2 + $0x78] sm:$0xff] }
 0xa2a   :  { %v3265_v46 = vpack.c.bf16 %v1050_v44, %v1049_v20 }
 0xa2b   :  { %1030 = vrot.lane.b32.xlu1 %v3042_v8, %s3626_s8 }
 0xa2d   :  { %1028 = vrot.lane.b32.xlu0 %v809_v9, %s3626_s8 }
 0xa9f   :  { %v926_v34 = vpop.xlane.xlu1 %925 }
 0xaa0   :  { %3510 = vrcp.f32 %v926_v34  ;;  %v923_v35 = vpop.xlane.xlu0 %922 }
 0xaa1   :  { %3512 = vrcp.f32 %v923_v35 }
 0xaa3   :  { %v1021_v51 = vpop.permute.xlu1 %1020 }
 0xaa4   :  { %v3439_v36 = vpop.permute.xlu0 %3438  ;;  %v1042_v55 = vsel %vm224_vm3, %v3725_v61, %v1021_v51 }
 0xaa5   :  { %v3441_v37 = vunpack.i.h.bf16 %v3439_v36  ;;  %v3440_v40 = vunpack.i.l.bf16 %v3439_v36 }
 0xaa7   :  { %v3261_v39 = vpack.c.bf16 %v3441_v37, %v3440_v40  ;;  %v1023_v52 = vpop.permute.xlu1 %1022 }
 0xaa8   :  { %v1029_v54 = vpop.permute.xlu0 %1028  ;;  %v1043_v57 = vsel %vm224_vm3, %v3723_v60, %v1023_v52  ;;  %v2807_v52 = vld [vmem:[#allocation2 + $0x2a] ss:$0 sm:$0xff] }
 0xaa9   :  { %3262 = vmatprep.subr.bf16.mxu1 %v3261_v39  ;;  %v1044_v58 = vsel %vm308_vm5, %v1042_v55, %v1029_v54 }
 0xaaa   :  { %v3511_v41 = vpop.eup %3510  ;;  %3264 = vmatpush3.bf16.msra.mxu1 %v3261_v39 }
 0xaab   :  { %v3513_v38 = vpop.eup %3512  ;;  %v930_v43 = vmul.f32 %v3511_v41, %v3507_v30  ;;  %3266 = vmatprep.subr.bf16.mxu1 %v3265_v46  ;;  %v1031_v53 = vpop.permute.xlu1 %1030  ;;  %v3285_v30 = vpack.c.bf16 %v1180_v29, %v1179_v25 }
 0xaac   :  { %v928_v42 = vmul.f32 %v3513_v38, %v3509_v31  ;;  %v1045_v62 = vsel %vm308_vm5, %v1043_v57, %v1031_v53  ;;  %v1181_v31 = vld [vmem:[#allocation2 + $0xd8] sm:$0xff]  ;;  %v2805_v38 = vld [vmem:[#allocation2 + $0x2c] ss:$0 sm:$0xff] }
 0xaad   :  { %v3289_v33 = vpack.c.bf16 %v1182_v32, %v1181_v31  ;;  %v2813_v31 = vld [vmem:[#allocation2 + $0x2e] ss:$0 sm:$0xff] }
 0xaae   :  { %3054 = vmatprep.mubr.msk.f32.mxu1 %vm308_vm5, %v928_v42 }
 0xaaf   :  { %3055 = vmatmul.mubr.msk.f32.vlgmr.msra.gmra.mrb[6].mxu1 %vm308_vm5, %v930_v43  ;;  %v2806_v43 = vld [vmem:[#allocation2 + $0x2d] ss:$0 sm:$0xff] }
 0xab0   :  { %3268 = vmatpush3.bf16.msra.mxu1 %v3265_v46 }
 0xab1   :  { %3270 = vmatprep.subr.bf16.mxu1 %v3269_v48 }
 0xab4   :  { %3272 = vmatpush3.bf16.msra.mxu1 %v3269_v48 }
 0xab5   :  { %3282 = vmatprep.subr.bf16.mxu1 %v3281_v28 }
 0xb82   :  { %v3056_v49 = vpop.f32.mrb[6].mxu1 }
 0xb83   :  { %1038 = vrot.lane.b32.xlu1 %v3056_v49, %s3627_s9  ;;  %v1009_v50 = vpop.f32.mrb[7].mxu1  ;;  %v1183_v49 = vld [vmem:[#allocation2 + $0xe8] sm:$0xff] }
 0xb84   :  { %1036 = vrot.lane.b32.xlu0 %v1009_v50, %s3627_s9  ;;  %v1184_v50 = vld [vmem:[#allocation2 + $0xf0] sm:$0xff] }
 0xb85   :  { %v3293_v51 = vpack.c.bf16 %v1184_v50, %v1183_v49 }
 0xbf5   :  { %v1039_v56 = vpop.permute.xlu1 %1038 }
 0xbf6   :  { %v1037_v59 = vpop.permute.xlu0 %1036  ;;  %v1048_v0 = vsel %vm1046_vm6, %v1045_v62, %v1039_v56 }
 0xbf7   :  { %v1047_v63 = vsel %vm1046_vm6, %v1044_v58, %v1037_v59  ;;  %v2810_v59 = vld [vmem:[#allocation2 + $0x2b] ss:$0 sm:$0xff] }
 0xbf8   :  { %3065 = vmatprep.mubr.msk.f32.mxu1 %vm136_vm2, %v1047_v63 }
 0xbf9   :  { %3066 = vmatmul.mubr.msk.f32.vlgmr.msra.gmra.mrb[8].mxu1 %vm136_vm2, %v1048_v0 }
 0xbfa   :  { %3284 = vmatpush3.bf16.msra.mxu1 %v3281_v28 }
 0xbfb   :  { %3286 = vmatprep.subr.bf16.mxu1 %v3285_v30 }
 0xbfe   :  { %3288 = vmatpush3.bf16.msra.mxu1 %v3285_v30 }
 0xbff   :  { %3290 = vmatprep.subr.bf16.mxu1 %v3289_v33 }
 0xc02   :  { %3292 = vmatpush3.bf16.msra.mxu1 %v3289_v33 }
 0xc03   :  { %3294 = vmatprep.subr.bf16.mxu1 %v3293_v51 }
 0xc06   :  { %3296 = vmatpush3.bf16.msra.mxu1 %v3293_v51 }
 0xccc   :  { %v3067_v1 = vpop.f32.mrb[8].mxu1 }
 0xccd   :  { %v1131_v61 = vadd.f32 %v3067_v1, %v3667_v17  ;;  %v1125_v2 = vpop.f32.mrb[9].mxu1 }
 0xcce   :  { %v1126_v3 = vadd.f32 %v1125_v2, %v3665_v16  ;;  %v1173_v16 = vld [vmem:[#allocation2 + $0x98] sm:$0xff] }
 0xccf   :  { %v1137_v60 = vsel %vm136_vm2, %v1131_v61, 0.0  ;;  %v3273_v13 = vpack.c.bf16 %v1174_v12, %v1173_v16  ;;  %v1405_v16 = vld [vmem:[#allocation2 + $0x100] sm:$0xff] }
 0xcd0   :  { %1138 = vadd.xlane.f32.xlu1 %v1137_v60  ;;  %v1134_v19 = vsel %vm136_vm2, %v1126_v3, 0.0 }
 0xcd1   :  { %1135 = vadd.xlane.f32.xlu0 %v1134_v19  ;;  %3274 = vmatprep.subr.bf16.mxu0 %v3273_v13 }
 0xcd2   :  { %3276 = vmatpush3.bf16.msra.mxu0 %v3273_v13  ;;  %v1406_v13 = vld [vmem:[#allocation2 + $0x108] sm:$0xff] }
 0xcd3   :  { %3278 = vmatprep.subr.bf16.mxu0 %v3277_v21  ;;  %v3301_v15 = vpack.c.bf16 %v1407_v14, %v1406_v13 }
 0xcd6   :  { %3280 = vmatpush3.bf16.msra.mxu0 %v3277_v21 }
 0xd5d   :  { %v1139_v4 = vpop.xlane.xlu1 %1138 }
 0xd5e   :  { %v1142_v18 = vmul.f32 0.03125, %v1139_v4  ;;  %v1136_v5 = vpop.xlane.xlu0 %1135 }
 0xd5f   :  { %v1141_v6 = vmul.f32 0.03125, %v1136_v5 }
 0xd60   :  { %v1144_v7 = vsub.f32 %v1131_v61, %v1142_v18 }
 0xd61   :  { %v1143_v8 = vsub.f32 %v1126_v3, %v1141_v6 }
 0xd62   :  { %v1146_v11 = vmul.f32 %v1144_v7, %v1144_v7 }
 0xd63   :  { %v1145_v9 = vmul.f32 %v1143_v8, %v1143_v8 }
 0xd64   :  { %v1150_v17 = vsel %vm136_vm2, %v1146_v11, 0.0 }
 0xd65   :  { %v1147_v10 = vsel %vm136_vm2, %v1145_v9, 0.0 }
 0xd66   :  { %1148 = vadd.xlane.f32.xlu0 %v1147_v10 }
 0xd6a   :  { %1151 = vadd.xlane.f32.xlu0 %v1150_v17  ;;  %v1404_v17 = vld [vmem:[#allocation2 + $0xf8] sm:$0xff] }
 0xd6b   :  { %v3297_v12 = vpack.c.bf16 %v1405_v16, %v1404_v17 }
 0xd6d   :  { %3298 = vmatprep.subr.bf16.mxu0 %v3297_v12 }
 0xdf3   :  { %v1149_v34 = vpop.xlane.xlu0 %1148 }
 0xdf4   :  { %v1153_v35 = vmul.f32 0.03125, %v1149_v34 }
 0xdf6   :  { %v1155_v36 = vadd.f32 1e-05, %v1153_v35  ;;  %v2814_v35 = vld [vmem:[#allocation2 + $0x2f] ss:$0 sm:$0xff] }
 0xdf7   :  { %v1152_v37 = vpop.xlane.xlu0 %1151 }
 0xdf8   :  { %3514 = vrsqrt.f32 %v1155_v36  ;;  %v1154_v40 = vmul.f32 0.03125, %v1152_v37 }
 0xdfa   :  { %v1156_v39 = vadd.f32 1e-05, %v1154_v40 }
 0xdfc   :  { %3516 = vrsqrt.f32 %v1156_v39 }
 0xe02   :  { %v3515_v41 = vpop.eup %3514 }
 0xe03   :  { %v1159_v42 = vmul.f32 %v3515_v41, %v1143_v8 }
 0xe05   :  { %v1165_v20 = vmul.f32 %v2805_v38, %v1159_v42 }
 0xe06   :  { %v3517_v44 = vpop.eup %3516 }
 0xe07   :  { %v1160_v45 = vmul.f32 %v3517_v44, %v1144_v7  ;;  %v1171_v46 = vadd.f32 %v2806_v43, %v1165_v20 }
 0xe09   :  { %v1166_v47 = vmul.f32 %v2805_v38, %v1160_v45  ;;  %3076 = vmatprep.mubr.msk.f32.mxu0 %vm136_vm2, %v1171_v46 }
 0xe0b   :  { %v1172_v48 = vadd.f32 %v2806_v43, %v1166_v47 }
 0xe0d   :  { %3077 = vmatmul.mubr.msk.f32.vlgmr.msra.gmra.mrb[12].mxu0 %vm136_vm2, %v1172_v48 }
 0xe0e   :  { %3300 = vmatpush3.bf16.msra.mxu0 %v3297_v12 }
 0xe0f   :  { %3302 = vmatprep.subr.bf16.mxu0 %v3301_v15 }
 0xe12   :  { %3304 = vmatpush3.bf16.msra.mxu0 %v3301_v15 }
 0xee0   :  { %v3078_v53 = vpop.f32.mrb[12].mxu0 }
 0xee1   :  { %v1267_v54 = vadd.f32 %v3078_v53, %v2807_v52  ;;  %v1261_v55 = vpop.f32.mrb[13].mxu0 }
 0xee2   :  { %v1262_v56 = vadd.f32 %v2807_v52, %v1261_v55 }
 0xee3   :  { %v1271_v58 = vmax.f32 %v1267_v54, 0.0 }
 0xee4   :  { %v1270_v57 = vmax.f32 %v1262_v56, 0.0 }
 0xee6   :  { %3095 = vmatprep.mubr.msk.f32.mxu1 %vm1276_vm7, %v1270_v57 }
 0xee7   :  { %3096 = vmatmul.mubr.msk.f32.vlgmr.msra.gmra.mrb[10].mxu1 %vm1276_vm7, %v1271_v58 }
 0xfba   :  { %v3097_v62 = vpop.f32.mrb[10].mxu1 }
 0xfbb   :  { %v1355_v63 = vadd.f32 %v3097_v62, %v2810_v59  ;;  %v1349_v0 = vpop.f32.mrb[11].mxu1 }
 0xfbc   :  { %v1350_v1 = vadd.f32 %v2810_v59, %v1349_v0 }
 0xfbd   :  { %v1359_v61 = vadd.f32 %v1355_v63, %v1172_v48 }
 0xfbe   :  { %v1358_v2 = vadd.f32 %v1350_v1, %v1171_v46 }
 0xfbf   :  { %v1363_v3 = vsel %vm136_vm2, %v1359_v61, 0.0 }
 0xfc0   :  { %1364 = vadd.xlane.f32.xlu0 %v1363_v3  ;;  %v1360_v60 = vsel %vm136_vm2, %v1358_v2, 0.0 }
 0xfc1   :  { %1361 = vadd.xlane.f32.xlu1 %v1360_v60 }
0x104d   :  { %v1365_v19 = vpop.xlane.xlu0 %1364 }
0x104e   :  { %v1367_v4 = vmul.f32 0.03125, %v1365_v19  ;;  %v1362_v18 = vpop.xlane.xlu1 %1361 }
0x104f   :  { %v1366_v5 = vmul.f32 0.03125, %v1362_v18 }
0x1050   :  { %v1369_v6 = vsub.f32 %v1359_v61, %v1367_v4 }
0x1051   :  { %v1368_v7 = vsub.f32 %v1358_v2, %v1366_v5 }
0x1052   :  { %v1371_v8 = vmul.f32 %v1369_v6, %v1369_v6 }
0x1053   :  { %v1370_v9 = vmul.f32 %v1368_v7, %v1368_v7 }
0x1054   :  { %v1375_v10 = vsel %vm136_vm2, %v1371_v8, 0.0 }
0x1055   :  { %1376 = vadd.xlane.f32.xlu0 %v1375_v10  ;;  %v1372_v11 = vsel %vm136_vm2, %v1370_v9, 0.0 }
0x1056   :  { %1373 = vadd.xlane.f32.xlu1 %v1372_v11 }
0x10e2   :  { %v1377_v21 = vpop.xlane.xlu0 %1376 }
0x10e3   :  { %v1379_v22 = vmul.f32 0.03125, %v1377_v21  ;;  %v1374_v23 = vpop.xlane.xlu1 %1373 }
0x10e4   :  { %v1378_v25 = vmul.f32 0.03125, %v1374_v23 }
0x10e5   :  { %v1381_v28 = vadd.f32 1e-05, %v1379_v22 }
0x10e6   :  { %v1380_v29 = vadd.f32 1e-05, %v1378_v25 }
0x10e7   :  { %3518 = vrsqrt.f32 %v1381_v28 }
0x10e8   :  { %3520 = vrsqrt.f32 %v1380_v29 }
0x10f1   :  { %v3519_v30 = vpop.eup %3518 }
0x10f2   :  { %v3521_v32 = vpop.eup %3520  ;;  %v1385_v33 = vmul.f32 %v3519_v30, %v1369_v6 }
0x10f3   :  { %v1384_v34 = vmul.f32 %v3521_v32, %v1368_v7 }
0x10f4   :  { %v1391_v36 = vmul.f32 %v2813_v31, %v1385_v33 }
0x10f5   :  { %v1390_v37 = vmul.f32 %v2813_v31, %v1384_v34 }
0x10f6   :  { %v3819_v39 = vadd.f32 %v2814_v35, %v1391_v36 }
0x10f7   :  { %v3817_v40 = vadd.f32 %v2814_v35, %v1390_v37 }
0x10f9   :  { %3106 = vmatprep.mubr.msk.f32.mxu0 %vm136_vm2, %v3817_v40 }
0x10fa   :  { %3107 = vmatmul.mubr.msk.f32.vlgmr.msra.gmra.mrb[14].mxu0 %vm136_vm2, %v3819_v39 }
0x11cd   :  { %v3825_v41 = vpop.f32.mrb[14].mxu0 }
0x11ce   :  { %v3827_v38 = vpop.f32.mrb[15].mxu0 }
0x11cf   :  { %3113 = vmatprep.mubr.msk.f32.mxu0 %vm224_vm3, %v3827_v38  ;;  %v3833_v42 = vpack.i.bf16 %v3825_v41, %v3827_v38 }
0x11d1   :  { %3448 = vrot.lane.b32.xlu0 %v3833_v42, %s3617_s27  ;;  %3443 = vrot.lane.b32.xlu1 %v3833_v42, %s3615_s0 }
0x11d5   :  { %1687 = vrot.lane.b32.xlu1 %v3827_v38, %s3618_s28 }
0x11d9   :  { %1689 = vrot.lane.b32.xlu1 %v3825_v41, %s3618_s28 }
0x1243   :  { %v3449_v43 = vpop.permute.xlu0 %3448  ;;  %v3444_v20 = vpop.permute.xlu1 %3443 }
0x1244   :  { %v3451_v44 = vunpack.i.h.bf16 %v3449_v43  ;;  %v3450_v45 = vunpack.i.l.bf16 %v3449_v43  ;;  %v3446_v46 = vunpack.i.h.bf16 %v3444_v20  ;;  %v3445_v47 = vunpack.i.l.bf16 %v3444_v20 }
0x1246   :  { %v3305_v48 = vpack.c.bf16 %v3446_v46, %v3445_v47  ;;  %v3315_v49 = vpack.c.bf16 %v3451_v44, %v3450_v45 }
0x1247   :  { %v1688_v50 = vpop.permute.xlu1 %1687 }
0x1248   :  { %3307 = vmatprep.subr.msk.bf16.mxu0 %vm3687_vm4, %v3305_v48 }
0x1249   :  { %3310 = vmatpush3.bf16.xpose.msk.msra.mxu0 %vm3687_vm4, %v3305_v48 }
0x124a   :  { %3317 = vmatprep.subr.msk.bf16.mxu0 %vm3687_vm4, %v3315_v49 }
0x124b   :  { %v1690_v51 = vpop.permute.xlu1 %1689 }
0x1250   :  { %3114 = vmatmul.mubr.msk.f32.vlgmr.msra.gmra.mrb[16].mxu0 %vm224_vm3, %v3825_v41 }
0x1251   :  { %3320 = vmatpush3.bf16.xpose.msk.msra.mxu0 %vm3687_vm4, %v3315_v49  ;;  %3127 = vmatprep.mubr.msk.f32.mxu0 %vm224_vm3, %v1688_v50 }
0x1258   :  { %3128 = vmatmul.mubr.msk.f32.vlgmr.msra.gmra.mrb[18].mxu0 %vm224_vm3, %v1690_v51 }
0x1323   :  { %v3115_v52 = vpop.f32.mrb[16].mxu0 }
0x1324   :  { %v1575_v53 = vadd.f32 %v3115_v52, %v3697_v26  ;;  %v1569_v54 = vpop.f32.mrb[17].mxu0 }
0x1325   :  { %v1570_v55 = vadd.f32 %v1569_v54, %v3699_v27 }
0x1326   :  { %v1581_v56 = vsel %vm308_vm5, %v1575_v53, -inf }
0x1327   :  { %1582 = vmax.xlane.f32.xlu1 %v1581_v56  ;;  %v1578_v57 = vsel %vm308_vm5, %v1570_v55, -inf }
0x1328   :  { %1579 = vmax.xlane.f32.xlu0 %v1578_v57 }
0x132b   :  { %v3129_v58 = vpop.f32.mrb[18].mxu0 }
0x132c   :  { %v1769_v59 = vpop.f32.mrb[19].mxu0  ;;  %v1775_v63 = vadd.f32 %v3129_v58, %v3697_v26 }
0x132d   :  { %v1770_v62 = vadd.f32 %v1769_v59, %v3699_v27 }
0x132e   :  { %v1781_v1 = vsel %vm308_vm5, %v1775_v63, -inf }
0x132f   :  { %v1778_v0 = vsel %vm308_vm5, %v1770_v62, -inf }
0x1330   :  { %1779 = vmax.xlane.f32.xlu0 %v1778_v0 }
0x1334   :  { %1782 = vmax.xlane.f32.xlu0 %v1781_v1 }
0x1338   :  { %3453 = vrot.lane.b32.xlu1 %v3833_v42, %s3616_s1 }
0x13b4   :  { %v1583_v61 = vpop.xlane.xlu1 %1582 }
0x13b5   :  { %v1585_v2 = vsub.f32 %v1575_v53, %v1583_v61  ;;  %v1580_v3 = vpop.xlane.xlu0 %1579 }
0x13b6   :  { %v1584_v60 = vsub.f32 %v1570_v55, %v1580_v3 }
0x13b7   :  { %v1588_v19 = vmul.f32 1.442695, %v1585_v2 }
0x13b8   :  { %v1586_v4 = vmul.f32 1.442695, %v1584_v60  ;;  %v3454_v18 = vpop.permute.xlu1 %3453 }
0x13b9   :  { %3522 = vpow2.f32 %v1588_v19  ;;  %v3456_v5 = vunpack.i.h.bf16 %v3454_v18  ;;  %v3455_v6 = vunpack.i.l.bf16 %v3454_v18 }
0x13ba   :  { %3524 = vpow2.f32 %v1586_v4 }
0x13bb   :  { %v3311_v7 = vpack.c.bf16 %v3456_v5, %v3455_v6 }
0x13bd   :  { %3312 = vmatprep.subr.bf16.mxu1 %v3311_v7  ;;  %v1780_v8 = vpop.xlane.xlu0 %1779 }
0x13be   :  { %3314 = vmatpush3.bf16.msra.mxu1 %v3311_v7  ;;  %v1784_v21 = vsub.f32 %v1770_v62, %v1780_v8 }
0x13c0   :  { %v1786_v22 = vmul.f32 1.442695, %v1784_v21 }
0x13c1   :  { %v1783_v9 = vpop.xlane.xlu0 %1782 }
0x13c2   :  { %v1785_v10 = vsub.f32 %v1775_v63, %v1783_v9 }
0x13c3   :  { %v3523_v11 = vpop.eup %3522 }
0x13c4   :  { %v3525_v17 = vpop.eup %3524  ;;  %v1788_v16 = vmul.f32 1.442695, %v1785_v10  ;;  %v1593_v12 = vsel %vm308_vm5, %v3523_v11, 0.0 }
0x13c5   :  { %1594 = vadd.xlane.f32.xlu0 %v1593_v12  ;;  %v1590_v13 = vsel %vm308_vm5, %v3525_v17, 0.0 }
0x13c6   :  { %3526 = vpow2.f32 %v1788_v16  ;;  %1591 = vadd.xlane.f32.xlu1 %v1590_v13 }
0x13c7   :  { %3528 = vpow2.f32 %v1786_v22 }
0x13d0   :  { %v3527_v14 = vpop.eup %3526 }
0x13d1   :  { %v1793_v15 = vsel %vm308_vm5, %v3527_v14, 0.0  ;;  %v3529_v23 = vpop.eup %3528 }
0x13d2   :  { %1794 = vadd.xlane.f32.xlu0 %v1793_v15  ;;  %v1790_v25 = vsel %vm308_vm5, %v3529_v23, 0.0 }
0x13d7   :  { %3463 = vrot.lane.b32.xlu1 %v3833_v42, %s3620_s30 }
0x13e8   :  { %3458 = vrot.lane.b32.xlu0 %v3833_v42, %s3619_s29 }
0x13ec   :  { %1889 = vrot.lane.b32.xlu0 %v3825_v41, %s3621_s3 }
0x13fb   :  { %1791 = vadd.xlane.f32.xlu1 %v1790_v25 }
0x140c   :  { %1887 = vrot.lane.b32.xlu1 %v3827_v38, %s3621_s3 }
0x1452   :  { %v1595_v28 = vpop.xlane.xlu0 %1594 }
0x1453   :  { %3530 = vrcp.f32 %v1595_v28  ;;  %v1592_v29 = vpop.xlane.xlu1 %1591 }
0x1454   :  { %3532 = vrcp.f32 %v1592_v29  ;;  %v3562_v29 = vld [vmem:[#allocation2 + $0x18] sm:$0xff] }
0x1457   :  { %v3464_v35 = vpop.permute.xlu1 %3463 }
0x1458   :  { %v3466_v37 = vunpack.i.h.bf16 %v3464_v35  ;;  %v3465_v43 = vunpack.i.l.bf16 %v3464_v35 }
0x145a   :  { %v3325_v46 = vpack.c.bf16 %v3466_v37, %v3465_v43 }
0x145d   :  { %v3531_v30 = vpop.eup %3530 }
0x145e   :  { %v3533_v31 = vpop.eup %3532  ;;  %v1599_v34 = vmul.f32 %v3531_v30, %v3523_v11 }
0x145f   :  { %v1795_v32 = vpop.xlane.xlu0 %1794  ;;  %v1597_v33 = vmul.f32 %v3533_v31, %v3525_v17 }
0x1460   :  { %3534 = vrcp.f32 %v1795_v32  ;;  %v3563_v32 = vld [vmem:[#allocation2 + $0x10] sm:$0xff] }
0x1461   :  { %3120 = vmatprep.mubr.msk.f32.mxu1 %vm308_vm5, %v1597_v33 }
0x1462   :  { %3121 = vmatmul.mubr.msk.f32.vlgmr.msra.gmra.mrb[12].mxu1 %vm308_vm5, %v1599_v34 }
0x1463   :  { %v3459_v36 = vpop.permute.xlu0 %3458 }
0x1464   :  { %v3461_v20 = vunpack.i.h.bf16 %v3459_v36  ;;  %v3460_v44 = vunpack.i.l.bf16 %v3459_v36 }
0x1466   :  { %v3321_v45 = vpack.c.bf16 %v3461_v20, %v3460_v44 }
0x1467   :  { %v1890_v53 = vpop.permute.xlu0 %1889 }
0x1468   :  { %3322 = vmatprep.subr.bf16.mxu1 %v3321_v45 }
0x1469   :  { %3324 = vmatpush3.bf16.msra.mxu1 %v3321_v45 }
0x146a   :  { %3327 = vmatprep.subr.msk.bf16.mxu1 %vm3687_vm4, %v3325_v46  ;;  %v3535_v48 = vpop.eup %3534 }
0x146b   :  { %v1799_v51 = vmul.f32 %v3535_v48, %v3527_v14 }
0x1488   :  { %v1792_v47 = vpop.xlane.xlu1 %1791 }
0x1489   :  { %3536 = vrcp.f32 %v1792_v47 }
0x148c   :  { %v1888_v52 = vpop.permute.xlu1 %1887 }
0x1493   :  { %v3537_v49 = vpop.eup %3536 }
0x1494   :  { %v1797_v50 = vmul.f32 %v3537_v49, %v3529_v23 }
0x1496   :  { %3134 = vmatprep.mubr.msk.f32.mxu1 %vm308_vm5, %v1797_v50 }
0x1497   :  { %3135 = vmatmul.mubr.msk.f32.vlgmr.msra.gmra.mrb[14].mxu1 %vm308_vm5, %v1799_v51 }
0x1498   :  { %3330 = vmatpush3.bf16.xpose.msk.msra.mxu1 %vm3687_vm4, %v3325_v46  ;;  %3141 = vmatprep.mubr.msk.f32.mxu1 %vm224_vm3, %v1888_v52 }
0x149f   :  { %3142 = vmatmul.mubr.msk.f32.vlgmr.msra.gmra.mrb[16].mxu1 %vm224_vm3, %v1890_v53 }
0x1535   :  { %v3887_v54 = vpop.f32.mrb[12].mxu1 }
0x1536   :  { %v3889_v55 = vpop.f32.mrb[13].mxu1 }
0x156a   :  { %v3891_v56 = vpop.f32.mrb[14].mxu1 }
0x156b   :  { %v3893_v57 = vpop.f32.mrb[15].mxu1 }
0x1572   :  { %v3143_v58 = vpop.f32.mrb[16].mxu1 }
0x1573   :  { %v1975_v59 = vadd.f32 %v3143_v58, %v3697_v26  ;;  %v1969_v62 = vpop.f32.mrb[17].mxu1 }
0x1574   :  { %v1970_v63 = vadd.f32 %v1969_v62, %v3699_v27 }
0x1575   :  { %v1981_v0 = vsel %vm308_vm5, %v1975_v59, -inf }
0x1576   :  { %1982 = vmax.xlane.f32.xlu0 %v1981_v0  ;;  %v1978_v1 = vsel %vm308_vm5, %v1970_v63, -inf  ;;  %v2319_v0 = vld [vmem:[#allocation2 + $0x128] sm:$0xff] }
0x1577   :  { %1979 = vmax.xlane.f32.xlu1 %v1978_v1 }
0x1603   :  { %v1983_v61 = vpop.xlane.xlu0 %1982 }
0x1604   :  { %v1985_v2 = vsub.f32 %v1975_v59, %v1983_v61  ;;  %v1980_v3 = vpop.xlane.xlu1 %1979  ;;  %v2320_v61 = vld [vmem:[#allocation2 + $0x130] sm:$0xff] }
0x1605   :  { %v1984_v60 = vsub.f32 %v1970_v63, %v1980_v3  ;;  %v2318_v63 = vld [vmem:[#allocation2 + $0x120] sm:$0xff] }
0x1606   :  { %v1988_v19 = vmul.f32 1.442695, %v1985_v2  ;;  %v3349_v2 = vpack.c.bf16 %v2320_v61, %v2319_v0  ;;  %v2451_v61 = vld [vmem:[#allocation2 + $0x190] sm:$0xff] }
0x1607   :  { %v1986_v4 = vmul.f32 1.442695, %v1984_v60 }
0x1608   :  { %3538 = vpow2.f32 %v1988_v19 }
0x1609   :  { %3540 = vpow2.f32 %v1986_v4 }
0x1612   :  { %v3539_v18 = vpop.eup %3538 }
0x1613   :  { %v3541_v5 = vpop.eup %3540  ;;  %v1993_v26 = vsel %vm308_vm5, %v3539_v18, 0.0 }
0x1614   :  { %1994 = vadd.xlane.f32.xlu1 %v1993_v26  ;;  %v1990_v27 = vsel %vm308_vm5, %v3541_v5, 0.0 }
0x1615   :  { %1991 = vadd.xlane.f32.xlu0 %v1990_v27 }
0x1625   :  { %3473 = vrot.lane.b32.xlu1 %v3833_v42, %s3622_s4 }
0x1629   :  { %2087 = vrot.lane.b32.xlu1 %v3827_v38, %s3623_s5 }
0x162b   :  { %3468 = vrot.lane.b32.xlu0 %v3833_v42, %s3624_s6 }
0x162f   :  { %2089 = vrot.lane.b32.xlu0 %v3825_v41, %s3623_s5 }
0x16a1   :  { %v1995_v6 = vpop.xlane.xlu1 %1994 }
0x16a2   :  { %3542 = vrcp.f32 %v1995_v6  ;;  %v1992_v7 = vpop.xlane.xlu0 %1991 }
0x16a3   :  { %3544 = vrcp.f32 %v1992_v7 }
0x16a5   :  { %v3474_v8 = vpop.permute.xlu1 %3473 }
0x16a6   :  { %v3469_v9 = vpop.permute.xlu0 %3468  ;;  %v3476_v10 = vunpack.i.h.bf16 %v3474_v8  ;;  %v3475_v11 = vunpack.i.l.bf16 %v3474_v8 }
0x16a7   :  { %v3471_v17 = vunpack.i.h.bf16 %v3469_v9  ;;  %v3470_v16 = vunpack.i.l.bf16 %v3469_v9 }
0x16a8   :  { %v3335_v13 = vpack.c.bf16 %v3476_v10, %v3475_v11 }
0x16a9   :  { %v3331_v12 = vpack.c.bf16 %v3471_v17, %v3470_v16  ;;  %v2088_v21 = vpop.permute.xlu1 %2087 }
0x16aa   :  { %v2090_v22 = vpop.permute.xlu0 %2089 }
0x16ab   :  { %3332 = vmatprep.subr.bf16.mxu0 %v3331_v12 }
0x16ac   :  { %v3543_v38 = vpop.eup %3542  ;;  %3334 = vmatpush3.bf16.msra.mxu0 %v3331_v12 }
0x16ad   :  { %v3545_v14 = vpop.eup %3544  ;;  %3337 = vmatprep.subr.msk.bf16.mxu0 %vm3687_vm4, %v3335_v13  ;;  %v1999_v15 = vmul.f32 %v3543_v38, %v3539_v18 }
0x16ae   :  { %v1997_v41 = vmul.f32 %v3545_v14, %v3541_v5 }
0x16b0   :  { %3148 = vmatprep.mubr.msk.f32.mxu0 %vm308_vm5, %v1997_v41 }
0x16b1   :  { %3149 = vmatmul.mubr.msk.f32.vlgmr.msra.gmra.mrb[20].mxu0 %vm308_vm5, %v1999_v15 }
0x16b2   :  { %3155 = vmatprep.mubr.msk.f32.mxu0 %vm224_vm3, %v2088_v21 }
0x16b5   :  { %3340 = vmatpush3.bf16.xpose.msk.msra.mxu0 %vm3687_vm4, %v3335_v13 }
0x16bc   :  { %3156 = vmatmul.mubr.msk.f32.vlgmr.msra.gmra.mrb[22].mxu0 %vm224_vm3, %v2090_v22 }
0x1784   :  { %v3150_v23 = vpop.f32.mrb[20].mxu0 }
0x1785   :  { %v2078_v25 = vpop.f32.mrb[21].mxu0 }
0x178f   :  { %v3157_v28 = vpop.f32.mrb[22].mxu0 }
0x1790   :  { %v2175_v30 = vadd.f32 %v3562_v29, %v3157_v28  ;;  %v2169_v31 = vpop.f32.mrb[23].mxu0  ;;  %v2441_v29 = vld [vmem:[#allocation2 + $0x140] sm:$0xff] }
0x1791   :  { %v2170_v33 = vadd.f32 %v3563_v32, %v2169_v31  ;;  %v2442_v31 = vld [vmem:[#allocation2 + $0x148] sm:$0xff]  ;;  %v2443_v32 = vld [vmem:[#allocation2 + $0x150] sm:$0xff] }
0x1792   :  { %v2181_v34 = vsel %vm308_vm5, %v2175_v30, -inf }
0x1793   :  { %2182 = vmax.xlane.f32.xlu0 %v2181_v34  ;;  %v2178_v35 = vsel %vm308_vm5, %v2170_v33, -inf  ;;  %v2444_v34 = vld [vmem:[#allocation2 + $0x158] sm:$0xff] }
0x1794   :  { %2179 = vmax.xlane.f32.xlu1 %v2178_v35  ;;  %v2445_v35 = vld [vmem:[#allocation2 + $0x160] sm:$0xff] }
0x1820   :  { %v2183_v36 = vpop.xlane.xlu0 %2182 }
0x1821   :  { %v2185_v24 = vsub.f32 %v2175_v30, %v2183_v36  ;;  %v2180_v37 = vpop.xlane.xlu1 %2179  ;;  %v2446_v36 = vld [vmem:[#allocation2 + $0x168] sm:$0xff] }
0x1822   :  { %v2184_v43 = vsub.f32 %v2170_v33, %v2180_v37  ;;  %v3357_v33 = vpack.c.bf16 %v2443_v32, %v2442_v31  ;;  %v2447_v37 = vld [vmem:[#allocation2 + $0x170] sm:$0xff] }
0x1823   :  { %v2188_v20 = vmul.f32 1.442695, %v2185_v24  ;;  %v3361_v24 = vpack.c.bf16 %v2445_v35, %v2444_v34 }
0x1824   :  { %v2186_v44 = vmul.f32 1.442695, %v2184_v43  ;;  %v3365_v43 = vpack.c.bf16 %v2447_v37, %v2446_v36 }
0x1825   :  { %3546 = vpow2.f32 %v2188_v20  ;;  %v2448_v20 = vld [vmem:[#allocation2 + $0x178] sm:$0xff] }
0x1826   :  { %3548 = vpow2.f32 %v2186_v44  ;;  %v2449_v44 = vld [vmem:[#allocation2 + $0x180] sm:$0xff] }
0x182f   :  { %v3547_v45 = vpop.eup %3546 }
0x1830   :  { %v3549_v46 = vpop.eup %3548  ;;  %v2193_v47 = vsel %vm308_vm5, %v3547_v45, 0.0 }
0x1831   :  { %2194 = vadd.xlane.f32.xlu1 %v2193_v47  ;;  %v2190_v48 = vsel %vm308_vm5, %v3549_v46, 0.0 }
0x1832   :  { %2191 = vadd.xlane.f32.xlu0 %v2190_v48 }
0x1842   :  { %2289 = vrot.lane.b32.xlu1 %v3893_v57, %s3614_s20 }
0x1846   :  { %2291 = vrot.lane.b32.xlu1 %v3891_v56, %s3614_s20 }
0x1848   :  { %3478 = vrot.lane.b32.xlu0 %v3833_v42, %s3625_s7  ;;  %v2317_v42 = vld [vmem:[#allocation2 + $0x118] sm:$0xff] }
0x1849   :  { %v3345_v1 = vpack.c.bf16 %v2318_v63, %v2317_v42 }
0x184a   :  { %2299 = vrot.lane.b32.xlu1 %v3150_v23, %s3626_s8 }
0x184c   :  { %2297 = vrot.lane.b32.xlu0 %v2078_v25, %s3626_s8 }
0x18be   :  { %v2195_v49 = vpop.xlane.xlu1 %2194 }
0x18bf   :  { %3550 = vrcp.f32 %v2195_v49  ;;  %v2192_v50 = vpop.xlane.xlu0 %2191 }
0x18c0   :  { %3552 = vrcp.f32 %v2192_v50 }
0x18c2   :  { %v2290_v19 = vpop.permute.xlu1 %2289 }
0x18c3   :  { %v3479_v51 = vpop.permute.xlu0 %3478  ;;  %v2311_v26 = vsel %vm224_vm3, %v3889_v55, %v2290_v19 }
0x18c4   :  { %v3481_v52 = vunpack.i.h.bf16 %v3479_v51  ;;  %v3480_v53 = vunpack.i.l.bf16 %v3479_v51 }
0x18c6   :  { %v3341_v58 = vpack.c.bf16 %v3481_v52, %v3480_v53  ;;  %v2292_v4 = vpop.permute.xlu1 %2291  ;;  %v2843_v53 = vld [vmem:[#allocation2 + $0x32] ss:$0 sm:$0xff] }
0x18c7   :  { %v2298_v5 = vpop.permute.xlu0 %2297  ;;  %v2312_v6 = vsel %vm224_vm3, %v3887_v54, %v2292_v4 }
0x18c8   :  { %3342 = vmatprep.subr.bf16.mxu1 %v3341_v58  ;;  %v2313_v7 = vsel %vm308_vm5, %v2311_v26, %v2298_v5 }
0x18c9   :  { %v3551_v57 = vpop.eup %3550  ;;  %3344 = vmatpush3.bf16.msra.mxu1 %v3341_v58 }
0x18ca   :  { %v3553_v59 = vpop.eup %3552  ;;  %v2199_v62 = vmul.f32 %v3551_v57, %v3547_v45  ;;  %3346 = vmatprep.subr.bf16.mxu1 %v3345_v1  ;;  %v2300_v18 = vpop.permute.xlu1 %2299  ;;  %v3369_v45 = vpack.c.bf16 %v2449_v44, %v2448_v20  ;;  %v2844_v57 = vld [vmem:[#allocation2 + $0x33] ss:$0 sm:$0xff]  ;;  %v2852_v44 = vld [vmem:[#allocation2 + $0x35] ss:$0 sm:$0xff] }
0x18cb   :  { %v2197_v56 = vmul.f32 %v3553_v59, %v3549_v46  ;;  %v2314_v9 = vsel %vm308_vm5, %v2312_v6, %v2300_v18 }
0x18cd   :  { %3162 = vmatprep.mubr.msk.f32.mxu1 %vm308_vm5, %v2197_v56 }
0x18ce   :  { %3163 = vmatmul.mubr.msk.f32.vlgmr.msra.gmra.mrb[18].mxu1 %vm308_vm5, %v2199_v62 }
0x18cf   :  { %3348 = vmatpush3.bf16.msra.mxu1 %v3345_v1  ;;  %v2450_v1 = vld [vmem:[#allocation2 + $0x188] sm:$0xff] }
0x18d0   :  { %3350 = vmatprep.subr.bf16.mxu1 %v3349_v2 }
0x18d3   :  { %3352 = vmatpush3.bf16.msra.mxu1 %v3349_v2  ;;  %v3373_v2 = vpack.c.bf16 %v2451_v61, %v2450_v1 }
0x18d4   :  { %3362 = vmatprep.subr.bf16.mxu1 %v3361_v24 }
0x19a1   :  { %v3164_v3 = vpop.f32.mrb[18].mxu1 }
0x19a2   :  { %2307 = vrot.lane.b32.xlu1 %v3164_v3, %s3627_s9  ;;  %v2278_v60 = vpop.f32.mrb[19].mxu1  ;;  %v2845_v3 = vld [vmem:[#allocation2 + $0x30] ss:$0 sm:$0xff] }
0x19a3   :  { %2305 = vrot.lane.b32.xlu0 %v2278_v60, %s3627_s9 }
0x1a14   :  { %v2308_v27 = vpop.permute.xlu1 %2307 }
0x1a15   :  { %v2306_v8 = vpop.permute.xlu0 %2305  ;;  %v2316_v11 = vsel %vm1046_vm6, %v2314_v9, %v2308_v27  ;;  %v2848_v27 = vld [vmem:[#allocation2 + $0x31] ss:$0 sm:$0xff] }
0x1a16   :  { %v2315_v10 = vsel %vm1046_vm6, %v2313_v7, %v2306_v8 }
0x1a17   :  { %3173 = vmatprep.mubr.msk.f32.mxu1 %vm136_vm2, %v2315_v10 }
0x1a18   :  { %3174 = vmatmul.mubr.msk.f32.vlgmr.msra.gmra.mrb[20].mxu1 %vm136_vm2, %v2316_v11 }
0x1a19   :  { %3364 = vmatpush3.bf16.msra.mxu1 %v3361_v24  ;;  %v2851_v24 = vld [vmem:[#allocation2 + $0x34] ss:$0 sm:$0xff] }
0x1a1a   :  { %3366 = vmatprep.subr.bf16.mxu1 %v3365_v43 }
0x1a1d   :  { %3368 = vmatpush3.bf16.msra.mxu1 %v3365_v43 }
0x1a1e   :  { %3370 = vmatprep.subr.bf16.mxu1 %v3369_v45 }
0x1a21   :  { %3372 = vmatpush3.bf16.msra.mxu1 %v3369_v45 }
0x1a22   :  { %3374 = vmatprep.subr.bf16.mxu1 %v3373_v2 }
0x1a25   :  { %3376 = vmatpush3.bf16.msra.mxu1 %v3373_v2 }
0x1aeb   :  { %v3175_v17 = vpop.f32.mrb[20].mxu1 }
0x1aec   :  { %v2399_v55 = vadd.f32 %v3175_v17, %v3819_v39  ;;  %v2393_v16 = vpop.f32.mrb[21].mxu1 }
0x1aed   :  { %v2394_v12 = vadd.f32 %v2393_v16, %v3817_v40  ;;  %v2440_v40 = vld [vmem:[#allocation2 + $0x138] sm:$0xff] }
0x1aee   :  { %v2405_v54 = vsel %vm136_vm2, %v2399_v55, 0.0  ;;  %v3353_v30 = vpack.c.bf16 %v2441_v29, %v2440_v40  ;;  %v2667_v40 = vld [vmem:[#allocation2 + $0x50] sm:$0xff] }
0x1aef   :  { %2406 = vadd.xlane.f32.xlu1 %v2405_v54  ;;  %v2402_v13 = vsel %vm136_vm2, %v2394_v12, 0.0 }
0x1af0   :  { %2403 = vadd.xlane.f32.xlu0 %v2402_v13  ;;  %3354 = vmatprep.subr.bf16.mxu0 %v3353_v30 }
0x1af1   :  { %3356 = vmatpush3.bf16.msra.mxu0 %v3353_v30 }
0x1af2   :  { %3358 = vmatprep.subr.bf16.mxu0 %v3357_v33 }
0x1af5   :  { %3360 = vmatpush3.bf16.msra.mxu0 %v3357_v33 }
0x1b7c   :  { %v2407_v38 = vpop.xlane.xlu1 %2406 }
0x1b7d   :  { %v2409_v14 = vmul.f32 0.03125, %v2407_v38  ;;  %v2404_v41 = vpop.xlane.xlu0 %2403 }
0x1b7e   :  { %v2408_v15 = vmul.f32 0.03125, %v2404_v41 }
0x1b7f   :  { %v2411_v21 = vsub.f32 %v2399_v55, %v2409_v14 }
0x1b80   :  { %v2410_v22 = vsub.f32 %v2394_v12, %v2408_v15 }
0x1b81   :  { %v2413_v28 = vmul.f32 %v2411_v21, %v2411_v21 }
0x1b82   :  { %v2412_v23 = vmul.f32 %v2410_v22, %v2410_v22 }
0x1b83   :  { %v2417_v39 = vsel %vm136_vm2, %v2413_v28, 0.0 }
0x1b84   :  { %v2414_v25 = vsel %vm136_vm2, %v2412_v23, 0.0  ;;  %v2664_v23 = vld [vmem:[#allocation2 + $0x38] sm:$0xff] }
0x1b85   :  { %2415 = vadd.xlane.f32.xlu0 %v2414_v25  ;;  %v2665_v25 = vld [vmem:[#allocation2 + $0x40] sm:$0xff] }
0x1b86   :  { %v3377_v28 = vpack.c.bf16 %v2665_v25, %v2664_v23 }
0x1b88   :  { %3378 = vmatprep.subr.bf16.mxu0 %v3377_v28 }
0x1b89   :  { %2418 = vadd.xlane.f32.xlu0 %v2417_v39  ;;  %v2666_v39 = vld [vmem:[#allocation2 + $0x48] sm:$0xff] }
0x1b8a   :  { %v3381_v29 = vpack.c.bf16 %v2667_v40, %v2666_v39 }
0x1c12   :  { %v2416_v46 = vpop.xlane.xlu0 %2415 }
0x1c13   :  { %v2420_v47 = vmul.f32 0.03125, %v2416_v46 }
0x1c15   :  { %v2422_v48 = vadd.f32 1e-05, %v2420_v47 }
0x1c16   :  { %v2419_v49 = vpop.xlane.xlu0 %2418 }
0x1c17   :  { %3554 = vrsqrt.f32 %v2422_v48  ;;  %v2421_v50 = vmul.f32 0.03125, %v2419_v49  ;;  %v2853_v49 = vld [vmem:[#allocation2 + $0x29] ss:$0 sm:$0xff] }
0x1c19   :  { %v2423_v51 = vadd.f32 1e-05, %v2421_v50 }
0x1c1b   :  { %3556 = vrsqrt.f32 %v2423_v51 }
0x1c21   :  { %v3555_v52 = vpop.eup %3554 }
0x1c22   :  { %v2426_v58 = vmul.f32 %v3555_v52, %v2410_v22 }
0x1c24   :  { %v2432_v59 = vmul.f32 %v2843_v53, %v2426_v58 }
0x1c25   :  { %v3557_v56 = vpop.eup %3556 }
0x1c26   :  { %v2427_v62 = vmul.f32 %v3557_v56, %v2411_v21  ;;  %v2438_v42 = vadd.f32 %v2844_v57, %v2432_v59 }
0x1c28   :  { %v2433_v63 = vmul.f32 %v2843_v53, %v2427_v62  ;;  %3184 = vmatprep.mubr.msk.f32.mxu0 %vm136_vm2, %v2438_v42 }
0x1c2a   :  { %v2439_v0 = vadd.f32 %v2844_v57, %v2433_v63 }
0x1c2c   :  { %3185 = vmatmul.mubr.msk.f32.vlgmr.msra.gmra.mrb[24].mxu0 %vm136_vm2, %v2439_v0 }
0x1c2d   :  { %3380 = vmatpush3.bf16.msra.mxu0 %v3377_v28 }
0x1c2e   :  { %3382 = vmatprep.subr.bf16.mxu0 %v3381_v29 }
0x1c31   :  { %3384 = vmatpush3.bf16.msra.mxu0 %v3381_v29 }
0x1cff   :  { %v3186_v60 = vpop.f32.mrb[24].mxu0 }
0x1d00   :  { %v2534_v19 = vadd.f32 %v3186_v60, %v2845_v3  ;;  %v2528_v4 = vpop.f32.mrb[25].mxu0 }
0x1d01   :  { %v2529_v18 = vadd.f32 %v2845_v3, %v2528_v4 }
0x1d02   :  { %v2538_v26 = vmax.f32 %v2534_v19, 0.0 }
0x1d03   :  { %v2537_v5 = vmax.f32 %v2529_v18, 0.0 }
0x1d05   :  { %3203 = vmatprep.mubr.msk.f32.mxu1 %vm1276_vm7, %v2537_v5 }
0x1d06   :  { %3204 = vmatmul.mubr.msk.f32.vlgmr.msra.gmra.mrb[22].mxu1 %vm1276_vm7, %v2538_v26 }
0x1dd9   :  { %v3205_v6 = vpop.f32.mrb[22].mxu1 }
0x1dda   :  { %v2621_v7 = vadd.f32 %v3205_v6, %v2848_v27  ;;  %v2615_v8 = vpop.f32.mrb[23].mxu1 }
0x1ddb   :  { %v2616_v9 = vadd.f32 %v2848_v27, %v2615_v8 }
0x1ddc   :  { %v2625_v10 = vadd.f32 %v2621_v7, %v2439_v0 }
0x1ddd   :  { %v2624_v11 = vadd.f32 %v2616_v9, %v2438_v42 }
0x1dde   :  { %v2629_v17 = vsel %vm136_vm2, %v2625_v10, 0.0 }
0x1ddf   :  { %2630 = vadd.xlane.f32.xlu0 %v2629_v17  ;;  %v2626_v55 = vsel %vm136_vm2, %v2624_v11, 0.0 }
0x1de0   :  { %2627 = vadd.xlane.f32.xlu1 %v2626_v55 }
0x1e6c   :  { %v2631_v16 = vpop.xlane.xlu0 %2630 }
0x1e6d   :  { %v2633_v12 = vmul.f32 0.03125, %v2631_v16  ;;  %v2628_v54 = vpop.xlane.xlu1 %2627 }
0x1e6e   :  { %v2632_v13 = vmul.f32 0.03125, %v2628_v54 }
0x1e6f   :  { %v2635_v38 = vsub.f32 %v2625_v10, %v2633_v12 }
0x1e70   :  { %v2634_v14 = vsub.f32 %v2624_v11, %v2632_v13 }
0x1e71   :  { %v2637_v41 = vmul.f32 %v2635_v38, %v2635_v38 }
0x1e72   :  { %v2636_v15 = vmul.f32 %v2634_v14, %v2634_v14 }
0x1e73   :  { %v2641_v21 = vsel %vm136_vm2, %v2637_v41, 0.0 }
0x1e74   :  { %2642 = vadd.xlane.f32.xlu0 %v2641_v21  ;;  %v2638_v22 = vsel %vm136_vm2, %v2636_v15, 0.0 }
0x1e75   :  { %2639 = vadd.xlane.f32.xlu1 %v2638_v22 }
0x1f01   :  { %v2643_v30 = vpop.xlane.xlu0 %2642 }
0x1f02   :  { %v2645_v31 = vmul.f32 0.03125, %v2643_v30  ;;  %v2640_v32 = vpop.xlane.xlu1 %2639 }
0x1f03   :  { %v2644_v33 = vmul.f32 0.03125, %v2640_v32 }
0x1f04   :  { %v2647_v34 = vadd.f32 1e-05, %v2645_v31 }
0x1f05   :  { %v2646_v35 = vadd.f32 1e-05, %v2644_v33 }
0x1f06   :  { %3558 = vrsqrt.f32 %v2647_v34 }
0x1f07   :  { %3560 = vrsqrt.f32 %v2646_v35 }
0x1f10   :  { %v3559_v36 = vpop.eup %3558 }
0x1f11   :  { %v3561_v37 = vpop.eup %3560  ;;  %v2651_v43 = vmul.f32 %v3559_v36, %v2635_v38 }
0x1f12   :  { %v2650_v20 = vmul.f32 %v3561_v37, %v2634_v14 }
0x1f13   :  { %v2657_v45 = vmul.f32 %v2851_v24, %v2651_v43 }
0x1f14   :  { %v2656_v46 = vmul.f32 %v2851_v24, %v2650_v20 }
0x1f15   :  { %v2663_v48 = vadd.f32 %v2852_v44, %v2657_v45 }
0x1f16   :  { %v2662_v47 = vadd.f32 %v2852_v44, %v2656_v46 }
0x1f18   :  { %3214 = vmatprep.mubr.msk.f32.mxu0 %vm136_vm2, %v2662_v47 }
0x1f19   :  { %3215 = vmatmul.mubr.msk.f32.vlgmr.msra.gmra.mrb[26].mxu0 %vm136_vm2, %v2663_v48 }
0x1fec   :  { %v3216_v50 = vpop.f32.mrb[26].mxu0 }
0x1fed   :  { %v2751_v51 = vadd.f32 %v3216_v50, %v2853_v49  ;;  %v2745_v52 = vpop.f32.mrb[27].mxu0 }
0x1fee   :  { %v2746_v53 = vadd.f32 %v2853_v49, %v2745_v52 }
0x1fef   :  { %2755 = vst [vmem:[#allocation5 + $0x8] sm:$0xff] %v2751_v51 }
0x1ff0   :  { %2754 = vst [vmem:[#allocation5] sm:$0xff] %v2746_v53 }
0x1ff1   :  { %3597 = shalt.err (!%p3594_p12)
}
0x1ff2   :  { %s3598_s15 = scalar_lea.hbm %s3976_s2, 256 }
0x1ff3   :  { %p3599_p13 = scmp.ne.s32.totalorder %s3976_s2, %s3598_s15  ;;  %p3602_p0 = scmp.lt.u32.totalorder %s3598_s15, %s3976_s2 }
0x1ff5   :  { %p3604_p1 = pnand %p3602_p0, %p3599_p13 }
0x1ff7   :  { %3607 = shalt.err (!%p3604_p1)
}
0x1ff8   :  { %2767 = dma.vmem_to_hbm [thread:$0]  %s2762_s11, 256, %s3976_s2, [#allocation4], %s3613_s19, %s3613_s19, %s3614_s20  }
0x1ff9   :  { %3610 = dma.done.wait [#allocation4], 256  }
0x1ffa   :  { %3611 = vsyncadd [#allocation4], 4294967040 }
0x1ffb   :  { %2771 = vsyncpa [#allocation3], 1 }
0x1ffc   :  { %2772 = vsyncpa [#allocation4], 1 }

</bundles_post_ra>
